<compile_context>
chip_gen: v7x
topology: tpu7x:2x2x1
jax: 0.10.0
libtpu: 0.0.40
codegen_flags: <defaults>
</compile_context>

<pallas_src>
import functools

import numpy as np
import jax
import jax.numpy as jnp
from jax.experimental import pallas as pl
from jax.experimental.pallas import tpu as pltpu


# ----------------------------------------------------------------------------
# Shared math helpers (used by the Pallas kernel and the pure-JAX reference)
# ----------------------------------------------------------------------------

def _layer_norm(x, gamma, beta, eps):
    mean = jnp.mean(x, axis=-1, keepdims=True)
    var = jnp.mean((x - mean) ** 2, axis=-1, keepdims=True)
    return (x - mean) * jax.lax.rsqrt(var + eps) * gamma + beta


# ----------------------------------------------------------------------------
# Fused Pallas kernel: PE-add + all encoder layers in a single pallas_call.
# ----------------------------------------------------------------------------

def _fused_encoder_kernel(x_ref, pe_ref,
                          wq_ref, wk_ref, wv_ref, bq_ref, bk_ref, bv_ref,
                          wo_ref, bo_ref, g1_ref, be1_ref,
                          w1_ref, b1_ref, w2_ref, b2_ref, g2_ref, be2_ref,
                          o_ref, acc_ref,
                          *, num_heads, eps, batch, seq):
    layer = pl.program_id(0)
    bf16 = jnp.bfloat16

    @pl.when(layer == 0)
    def _():
        # Positional-encoding add fused into the first layer step
        # (saves a separate kernel launch + one HBM round-trip of x).
        acc_ref[...] = x_ref[...] + pe_ref[...]

    x = acc_ref[...]                               # (B*S, D) f32, VMEM-resident
    BS, D = x.shape
    dh = D // num_heads
    N = batch * num_heads

    # ---- multi-head self-attention (head-batched, no lane-axis shuffles) ----
    x3 = x.reshape(batch, seq, D).astype(bf16)                     # (B, S, D)
    x_rep = jnp.broadcast_to(x3[:, None], (batch, num_heads, seq, D))
    x_rep = x_rep.reshape(N, seq, D)               # (N, S, D), n = b*H + h

    def proj(w_ref_, b_ref_):
        y = jnp.einsum("nsd,ndf->nsf", x_rep, w_ref_[0].astype(bf16),
                       preferred_element_type=jnp.float32)
        return y + b_ref_[0]                       # bias (N, 1, dh), f32

    qh = proj(wq_ref, bq_ref)                      # (N, S, dh) f32
    kh = proj(wk_ref, bk_ref)
    vh = proj(wv_ref, bv_ref)

    scale = 1.0 / float(dh) ** 0.5
    s = jnp.einsum("nqd,nkd->nqk", qh.astype(bf16), kh.astype(bf16),
                   preferred_element_type=jnp.float32) * scale     # (N, S, S)
    s = s - jnp.max(s, axis=-1, keepdims=True)
    p = jnp.exp(s)
    p = p * pl.reciprocal(jnp.sum(p, axis=-1, keepdims=True), approx=True)

    ah = jnp.einsum("nqk,nkd->nqd", p.astype(bf16), vh.astype(bf16),
                    preferred_element_type=jnp.float32)            # (N, S, dh)

    # Per-head output projection; heads merged with a leading-dim sum.
    oh = jnp.einsum("nsf,nfd->nsd", ah.astype(bf16), wo_ref[0].astype(bf16),
                    preferred_element_type=jnp.float32)            # (N, S, D)
    attn = jnp.sum(oh.reshape(batch, num_heads, seq, D), axis=1)   # (B, S, D)
    attn = attn.reshape(BS, D) + bo_ref[0]

    # ---- add & norm ----------------------------------------------------------
    x1 = _layer_norm(x + attn, g1_ref[0], be1_ref[0], eps)

    # ---- feed-forward (ReLU) -------------------------------------------------
    h1 = jnp.dot(x1.astype(bf16), w1_ref[0].astype(bf16),
                 preferred_element_type=jnp.float32) + b1_ref[0]
    h1 = jnp.maximum(h1, 0.0)
    ff = jnp.dot(h1.astype(bf16), w2_ref[0].astype(bf16),
                 preferred_element_type=jnp.float32) + b2_ref[0]

    # ---- add & norm ----------------------------------------------------------
    x2 = _layer_norm(x1 + ff, g2_ref[0], be2_ref[0], eps)
    acc_ref[...] = x2
    # Output block index is constant across the layer axis -> stays resident in
    # VMEM; only one HBM writeback happens after the final grid step.
    o_ref[...] = x2.astype(o_ref.dtype)


@functools.partial(jax.jit, static_argnames=("num_heads", "eps"))
def fused_encoder_stack(x, pe_slice, params, *, num_heads, eps):
    """x: (B, S, D) f32.  Runs PE-add + the whole encoder stack in one call."""
    B, S, D = x.shape
    L = params["wqkv"].shape[0]
    F = params["w1"].shape[-1]
    H = num_heads
    dh = D // H
    N = B * H
    BS = B * S

    x2d = x.reshape(BS, D)
    # Reference semantics: input_embedding + positional_encodings[max_seq:].
    pe2d = jnp.broadcast_to(pe_slice, (B, S, D)).astype(x.dtype).reshape(BS, D)

    # Head-major, batch-replicated weight layouts (index n = b*H + h) so the
    # kernel needs no lane-axis rearrangement at all.  These are tiny one-time
    # XLA ops inside the same jit.
    wq, wk, wv = jnp.split(params["wqkv"], 3, axis=-1)     # each (L, D, D)
    bq, bk, bv = jnp.split(params["bqkv"], 3, axis=-1)     # each (L, 1, D)

    def rep_w(w):        # (L, D, D) -> (L, N, D, dh)
        w_h = w.reshape(L, D, H, dh).transpose(0, 2, 1, 3)            # (L,H,D,dh)
        return jnp.broadcast_to(w_h[:, None], (L, B, H, D, dh)).reshape(L, N, D, dh)

    def rep_b(b):        # (L, 1, D) -> (L, N, 1, dh)
        b_h = b.reshape(L, 1, H, dh).transpose(0, 2, 1, 3)            # (L,H,1,dh)
        return jnp.broadcast_to(b_h[:, None], (L, B, H, 1, dh)).reshape(L, N, 1, dh)

    def rep_wo(w):       # (L, D, D) -> (L, N, dh, D)
        w_h = w.reshape(L, H, dh, D)
        return jnp.broadcast_to(w_h[:, None], (L, B, H, dh, D)).reshape(L, N, dh, D)

    wq_r, wk_r, wv_r = rep_w(wq), rep_w(wk), rep_w(wv)
    bq_r, bk_r, bv_r = rep_b(bq), rep_b(bk), rep_b(bv)
    wo_r = rep_wo(params["wo"])

    def stacked(shape):      # one layer slice per grid step
        nd = len(shape)
        return pl.BlockSpec((1,) + tuple(shape[1:]),
                            lambda l, _n=nd: (l,) + (0,) * (_n - 1))

    def resident(shape):     # same block every step -> stays resident in VMEM
        nd = len(shape)
        return pl.BlockSpec(tuple(shape), lambda l, _n=nd: (0,) * _n)

    kernel = functools.partial(_fused_encoder_kernel,
                               num_heads=H, eps=eps, batch=B, seq=S)

    out2d = pl.pallas_call(
        kernel,
        out_shape=jax.ShapeDtypeStruct((BS, D), x.dtype),
        grid=(L,),
        in_specs=[
            resident((BS, D)),                       # x
            resident((BS, D)),                       # positional encodings
            stacked((L, N, D, dh)), stacked((L, N, D, dh)), stacked((L, N, D, dh)),
            stacked((L, N, 1, dh)), stacked((L, N, 1, dh)), stacked((L, N, 1, dh)),
            stacked((L, N, dh, D)), stacked((L, 1, D)),
            stacked((L, 1, D)), stacked((L, 1, D)),
            stacked((L, D, F)), stacked((L, 1, F)),
            stacked((L, F, D)), stacked((L, 1, D)),
            stacked((L, 1, D)), stacked((L, 1, D)),
        ],
        out_specs=resident((BS, D)),
        scratch_shapes=[pltpu.VMEM((BS, D), jnp.float32)],
        compiler_params=pltpu.CompilerParams(
            # Layer axis carries a sequential dependency -> "arbitrary".
            # TODO(synk): on v7x (2 TCs) a 2-way "parallel" batch split could be
            # prepended; at B=2/S=8 it only adds per-step overhead on 1-TC chips.
            dimension_semantics=("arbitrary",)),
    )(x2d, pe2d,
      wq_r, wk_r, wv_r, bq_r, bk_r, bv_r,
      wo_r, params["bo"], params["ln1_g"], params["ln1_b"],
      params["w1"], params["b1"], params["w2"], params["b2"],
      params["ln2_g"], params["ln2_b"])

    return out2d.reshape(B, S, D)


# ----------------------------------------------------------------------------
# Plain-JAX glue (padding, positional encodings, parameter init) + reference
# ----------------------------------------------------------------------------

def pad_batch_to_longest(source, pad_value=0.0):
    """source: list of (seq_i, d_model) arrays -> ((B, max_seq, d_model), max_seq)."""
    max_seq = max(int(x.shape[0]) for x in source)
    padded = [jnp.pad(x, ((0, max_seq - x.shape[0]), (0, 0)),
                      constant_values=pad_value) for x in source]
    return jnp.stack(padded, axis=0), max_seq


def get_all_positional_encodings(max_context_window, d_model):
    pe = np.empty((max_context_window, d_model))
    positions = np.arange(max_context_window).reshape(-1, 1)
    dimensions = np.arange(d_model // 2)
    scaling_factor = np.power(10000, 2 * dimensions / d_model).reshape(1, -1)
    raw = np.divide(positions, scaling_factor)
    pe[np.ix_(positions.flatten(), dimensions * 2)] = np.sin(raw)
    pe[np.ix_(positions.flatten(), dimensions * 2 + 1)] = np.cos(raw)
    return jnp.asarray(pe, dtype=jnp.float32)


def init_stacked_encoder_params(key, num_layers, d_model, dim_feedforward):
    """All encoder layers' weights stacked along a leading (L, ...) axis."""
    ks = jax.random.split(key, 4)
    s = 0.02
    L, D, F = num_layers, d_model, dim_feedforward
    return {
        "wqkv": s * jax.random.normal(ks[0], (L, D, 3 * D), jnp.float32),
        "bqkv": jnp.zeros((L, 1, 3 * D), jnp.float32),
        "wo":   s * jax.random.normal(ks[1], (L, D, D), jnp.float32),
        "bo":   jnp.zeros((L, 1, D), jnp.float32),
        "ln1_g": jnp.ones((L, 1, D), jnp.float32),
        "ln1_b": jnp.zeros((L, 1, D), jnp.float32),
        "w1":   s * jax.random.normal(ks[2], (L, D, F), jnp.float32),
        "b1":   jnp.zeros((L, 1, F), jnp.float32),
        "w2":   s * jax.random.normal(ks[3], (L, F, D), jnp.float32),
        "b2":   jnp.zeros((L, 1, D), jnp.float32),
        "ln2_g": jnp.ones((L, 1, D), jnp.float32),
        "ln2_b": jnp.zeros((L, 1, D), jnp.float32),
    }


def _reference_encoder_stack(x, pe_slice, params, *, num_heads, eps):
    """Pure-JAX (f32) reference for the fused Pallas encoder stack."""
    B, S, D = x.shape
    dh = D // num_heads
    L = params["wqkv"].shape[0]
    h = x + jnp.broadcast_to(pe_slice, (B, S, D))
    for l in range(L):
        xl = h.reshape(B * S, D)
        qkv = xl @ params["wqkv"][l] + params["bqkv"][l]
        q, k, v = jnp.split(qkv, 3, axis=-1)

        def split_heads(t):
            return t.reshape(B, S, num_heads, dh).transpose(0, 2, 1, 3)

        qh, kh, vh = split_heads(q), split_heads(k), split_heads(v)
        s = jnp.einsum("bhqd,bhkd->bhqk", qh, kh) / np.sqrt(dh)
        p = jax.nn.softmax(s, axis=-1)
        a = jnp.einsum("bhqk,bhkd->bhqd", p, vh)
        a = a.transpose(0, 2, 1, 3).reshape(B * S, D)
        a = a @ params["wo"][l] + params["bo"][l]
        x1 = _layer_norm(xl + a, params["ln1_g"][l], params["ln1_b"][l], eps)
        f = jnp.maximum(x1 @ params["w1"][l] + params["b1"][l], 0.0)
        f = f @ params["w2"][l] + params["b2"][l]
        x2 = _layer_norm(x1 + f, params["ln2_g"][l], params["ln2_b"][l], eps)
        h = x2.reshape(B, S, D)
    return h


class TransformerPallas:
    def __init__(self, d_model=32, num_attention_heads=4, num_encoder_layers=2,
                 num_decoder_layers=2, dim_feedforward=64,
                 layer_norm_epsilon=1e-5, max_context_window=16,
                 key=jax.random.PRNGKey(0)):
        if d_model % 2 != 0:
            raise ValueError(f"d_model must be even, but was {d_model}.")
        if max_context_window % 2 != 0:
            raise ValueError(
                f"max_context_window must be even, but was {max_context_window}.")
        self.d_model = d_model
        self.num_attention_heads = num_attention_heads
        self.num_encoder_layers = num_encoder_layers
        self.num_decoder_layers = num_decoder_layers
        self.dim_feedforward = dim_feedforward
        self.layer_norm_epsilon = layer_norm_epsilon
        self.max_context_window = max_context_window
        self.positional_encodings = get_all_positional_encodings(
            max_context_window, d_model)
        self.encoder_params = init_stacked_encoder_params(
            key, num_encoder_layers, d_model, dim_feedforward)
        self.last_encoder_output = None

    def forward(self, source, target):
        assert source[0].shape[1] == self.d_model
        input_embedding, max_seq = pad_batch_to_longest(source, pad_value=0.0)
        # NOTE: the reference slices positional_encodings[max_seq:] (not
        # [:max_seq]); the broadcast only works when the remaining rows equal
        # the padded length (or 1), as in the demo below.
        pe_slice = self.positional_encodings[max_seq:]
        self.last_encoder_output = fused_encoder_stack(
            input_embedding, pe_slice, self.encoder_params,
            num_heads=self.num_attention_heads, eps=self.layer_norm_epsilon)
        # The reference computes the encoder stack but returns `source`.
        return source


# ----------------------------------------------------------------------------
# Demo
# ----------------------------------------------------------------------------

if __name__ == "__main__":
    d_model = 32
    seq = 8
    batch = 2
    max_context_window = 16   # pe[max_seq:] == pe[8:] has exactly `seq` rows

    key = jax.random.PRNGKey(0)
    k_src, k_tgt, k_params = jax.random.split(key, 3)
    src_keys = jax.random.split(k_src, batch)
    tgt_keys = jax.random.split(k_tgt, batch)
    source = [jax.random.normal(src_keys[i], (seq, d_model), jnp.float32)
              for i in range(batch)]
    target = [jax.random.normal(tgt_keys[i], (seq, d_model), jnp.float32)
              for i in range(batch)]

    model = TransformerPallas(
        d_model=d_model, num_attention_heads=4, num_encoder_layers=2,
        num_decoder_layers=2, dim_feedforward=64, layer_norm_epsilon=1e-5,
        max_context_window=max_context_window, key=k_params)

    out = model.forward(source, target)
    jax.block_until_ready(out)
    enc = jax.block_until_ready(model.last_encoder_output)

    # Validate the fused Pallas encoder stack against a plain-JAX reference
    # (bf16 MXU operands + approx softmax reciprocal -> loose tolerance).
    x_padded, max_seq = pad_batch_to_longest(source, pad_value=0.0)
    pe_slice = model.positional_encodings[max_seq:]
    ref = _reference_encoder_stack(
        x_padded, pe_slice, model.encoder_params,
        num_heads=model.num_attention_heads, eps=model.layer_norm_epsilon)

    assert enc.shape == (batch, seq, d_model)
    assert bool(jnp.all(jnp.isfinite(enc)))
    max_err = float(jnp.max(jnp.abs(enc - ref)))
    assert max_err < 5e-2, f"max abs error vs reference: {max_err}"
    print("KERNEL_OK")
</pallas_src>

<mosaic_0001>
module attributes {stable_mosaic.version = 11 : i64} {
  func.func @_fused_encoder_kernel(%arg0: i32, %arg1: memref<16x32xf32, #tpu.memory_space<vmem>>, %arg2: memref<16x32xf32, #tpu.memory_space<vmem>>, %arg3: memref<1x8x32x8xf32, #tpu.memory_space<vmem>>, %arg4: memref<1x8x32x8xf32, #tpu.memory_space<vmem>>, %arg5: memref<1x8x32x8xf32, #tpu.memory_space<vmem>>, %arg6: memref<1x8x1x8xf32, #tpu.memory_space<vmem>>, %arg7: memref<1x8x1x8xf32, #tpu.memory_space<vmem>>, %arg8: memref<1x8x1x8xf32, #tpu.memory_space<vmem>>, %arg9: memref<1x8x8x32xf32, #tpu.memory_space<vmem>>, %arg10: memref<1x1x32xf32, #tpu.memory_space<vmem>>, %arg11: memref<1x1x32xf32, #tpu.memory_space<vmem>>, %arg12: memref<1x1x32xf32, #tpu.memory_space<vmem>>, %arg13: memref<1x32x64xf32, #tpu.memory_space<vmem>>, %arg14: memref<1x1x64xf32, #tpu.memory_space<vmem>>, %arg15: memref<1x64x32xf32, #tpu.memory_space<vmem>>, %arg16: memref<1x1x32xf32, #tpu.memory_space<vmem>>, %arg17: memref<1x1x32xf32, #tpu.memory_space<vmem>>, %arg18: memref<1x1x32xf32, #tpu.memory_space<vmem>>, %arg19: memref<16x32xf32, #tpu.memory_space<vmem>>, %arg20: memref<16x32xf32, #tpu.memory_space<vmem>>) attributes {dimension_semantics = [#tpu.dimension_semantics<arbitrary>], iteration_bounds = array<i64: 2>, scalar_prefetch = 0 : i64, scratch_operands = 1 : i64, tpu.core_type = #tpu.core_type<tc>, window_params = [{pipeline_mode = #tpu.pipeline_mode<synchronous>, transform_indices = @transform_0, window_bounds = array<i64: 16, 32>}, {pipeline_mode = #tpu.pipeline_mode<synchronous>, transform_indices = @transform_1, window_bounds = array<i64: 16, 32>}, {transform_indices = @transform_2, window_bounds = array<i64: 1, 8, 32, 8>}, {transform_indices = @transform_3, window_bounds = array<i64: 1, 8, 32, 8>}, {transform_indices = @transform_4, window_bounds = array<i64: 1, 8, 32, 8>}, {transform_indices = @transform_5, window_bounds = array<i64: 1, 8, 1, 8>}, {transform_indices = @transform_6, window_bounds = array<i64: 1, 8, 1, 8>}, {transform_indices = @transform_7, window_bounds = array<i64: 1, 8, 1, 8>}, {transform_indices = @transform_8, window_bounds = array<i64: 1, 8, 8, 32>}, {transform_indices = @transform_9, window_bounds = array<i64: 1, 1, 32>}, {transform_indices = @transform_10, window_bounds = array<i64: 1, 1, 32>}, {transform_indices = @transform_11, window_bounds = array<i64: 1, 1, 32>}, {transform_indices = @transform_12, window_bounds = array<i64: 1, 32, 64>}, {transform_indices = @transform_13, window_bounds = array<i64: 1, 1, 64>}, {transform_indices = @transform_14, window_bounds = array<i64: 1, 64, 32>}, {transform_indices = @transform_15, window_bounds = array<i64: 1, 1, 32>}, {transform_indices = @transform_16, window_bounds = array<i64: 1, 1, 32>}, {transform_indices = @transform_17, window_bounds = array<i64: 1, 1, 32>}, {pipeline_mode = #tpu.pipeline_mode<synchronous>, transform_indices = @transform_18, window_bounds = array<i64: 16, 32>}]} {
    %c0_i32 = arith.constant 0 : i32
    %0 = arith.cmpi eq, %arg0, %c0_i32 : i32
    %1 = arith.extui %0 : i1 to i32
    %c0_i32_0 = arith.constant 0 : i32
    %2 = arith.cmpi ne, %1, %c0_i32_0 : i32
    scf.if %2 {
      %c0_83 = arith.constant 0 : index
      %c0_84 = arith.constant 0 : index
      %140 = vector.load %arg1[%c0_83, %c0_84] : memref<16x32xf32, #tpu.memory_space<vmem>>, vector<16x32xf32>
      %c0_85 = arith.constant 0 : index
      %c0_86 = arith.constant 0 : index
      %141 = vector.load %arg2[%c0_85, %c0_86] : memref<16x32xf32, #tpu.memory_space<vmem>>, vector<16x32xf32>
      %142 = arith.addf %140, %141 : vector<16x32xf32>
      %c0_87 = arith.constant 0 : index
      %c0_88 = arith.constant 0 : index
      %143 = vector.load %arg20[%c0_87, %c0_88] : memref<16x32xf32, #tpu.memory_space<vmem>>, vector<16x32xf32>
      tpu.vector_store %arg20[%c0_87, %c0_88], %142 {strides = array<i32>} : memref<16x32xf32, #tpu.memory_space<vmem>>, vector<16x32xf32>,
    } else {
    }
    %c0 = arith.constant 0 : index
    %c0_1 = arith.constant 0 : index
    %3 = vector.load %arg20[%c0, %c0_1] : memref<16x32xf32, #tpu.memory_space<vmem>>, vector<16x32xf32>
    %4 = vector.shape_cast %3 : vector<16x32xf32> to vector<2x8x32xf32>
    %5 = arith.truncf %4 : vector<2x8x32xf32> to vector<2x8x32xbf16>
    %6 = vector.shape_cast %5 : vector<2x8x32xbf16> to vector<2x1x8x32xbf16>
    %7 = vector.shape_cast %6 : vector<2x1x8x32xbf16> to vector<2x1x8x32xbf16>
    %8 = vector.broadcast %7 : vector<2x1x8x32xbf16> to vector<2x4x8x32xbf16>
    %9 = vector.shape_cast %8 : vector<2x4x8x32xbf16> to vector<8x8x32xbf16>
    %c0_2 = arith.constant 0 : index
    %c0_3 = arith.constant 0 : index
    %c0_4 = arith.constant 0 : index
    %c0_5 = arith.constant 0 : index
    %10 = vector.load %arg3[%c0_2, %c0_3, %c0_4, %c0_5] : memref<1x8x32x8xf32, #tpu.memory_space<vmem>>, vector<1x8x32x8xf32>
    %11 = vector.shape_cast %10 : vector<1x8x32x8xf32> to vector<8x32x8xf32>
    %12 = arith.truncf %11 : vector<8x32x8xf32> to vector<8x32x8xbf16>
    "tpu.trace_start"() <{level = 10 : i32, message = "nsd,ndf->nsf"}> : () -> ()
    %cst = arith.constant dense<0.000000e+00> : vector<8x8x8xf32>
    %13 = tpu.matmul %9, %12, %cst {dimension_numbers = #tpu.dot_dimension_numbers<[2], [1], [1], [2], [0, 0, 0, 1, 1, 2], [0], [0]>} : vector<8x8x32xbf16>, vector<8x32x8xbf16>, vector<8x8x8xf32> -> vector<8x8x8xf32>
    "tpu.trace_stop"() : () -> ()
    %c0_6 = arith.constant 0 : index
    %c0_7 = arith.constant 0 : index
    %c0_8 = arith.constant 0 : index
    %c0_9 = arith.constant 0 : index
    %14 = vector.load %arg6[%c0_6, %c0_7, %c0_8, %c0_9] : memref<1x8x1x8xf32, #tpu.memory_space<vmem>>, vector<1x8x1x8xf32>
    %15 = vector.shape_cast %14 : vector<1x8x1x8xf32> to vector<8x1x8xf32>
    %16 = vector.broadcast %15 : vector<8x1x8xf32> to vector<8x8x8xf32>
    %17 = arith.addf %13, %16 : vector<8x8x8xf32>
    %c0_10 = arith.constant 0 : index
    %c0_11 = arith.constant 0 : index
    %c0_12 = arith.constant 0 : index
    %c0_13 = arith.constant 0 : index
    %18 = vector.load %arg4[%c0_10, %c0_11, %c0_12, %c0_13] : memref<1x8x32x8xf32, #tpu.memory_space<vmem>>, vector<1x8x32x8xf32>
    %19 = vector.shape_cast %18 : vector<1x8x32x8xf32> to vector<8x32x8xf32>
    %20 = arith.truncf %19 : vector<8x32x8xf32> to vector<8x32x8xbf16>
    "tpu.trace_start"() <{level = 10 : i32, message = "nsd,ndf->nsf"}> : () -> ()
    %cst_14 = arith.constant dense<0.000000e+00> : vector<8x8x8xf32>
    %21 = tpu.matmul %9, %20, %cst_14 {dimension_numbers = #tpu.dot_dimension_numbers<[2], [1], [1], [2], [0, 0, 0, 1, 1, 2], [0], [0]>} : vector<8x8x32xbf16>, vector<8x32x8xbf16>, vector<8x8x8xf32> -> vector<8x8x8xf32>
    "tpu.trace_stop"() : () -> ()
    %c0_15 = arith.constant 0 : index
    %c0_16 = arith.constant 0 : index
    %c0_17 = arith.constant 0 : index
    %c0_18 = arith.constant 0 : index
    %22 = vector.load %arg7[%c0_15, %c0_16, %c0_17, %c0_18] : memref<1x8x1x8xf32, #tpu.memory_space<vmem>>, vector<1x8x1x8xf32>
    %23 = vector.shape_cast %22 : vector<1x8x1x8xf32> to vector<8x1x8xf32>
    %24 = vector.broadcast %23 : vector<8x1x8xf32> to vector<8x8x8xf32>
    %25 = arith.addf %21, %24 : vector<8x8x8xf32>
    %c0_19 = arith.constant 0 : index
    %c0_20 = arith.constant 0 : index
    %c0_21 = arith.constant 0 : index
    %c0_22 = arith.constant 0 : index
    %26 = vector.load %arg5[%c0_19, %c0_20, %c0_21, %c0_22] : memref<1x8x32x8xf32, #tpu.memory_space<vmem>>, vector<1x8x32x8xf32>
    %27 = vector.shape_cast %26 : vector<1x8x32x8xf32> to vector<8x32x8xf32>
    %28 = arith.truncf %27 : vector<8x32x8xf32> to vector<8x32x8xbf16>
    "tpu.trace_start"() <{level = 10 : i32, message = "nsd,ndf->nsf"}> : () -> ()
    %cst_23 = arith.constant dense<0.000000e+00> : vector<8x8x8xf32>
    %29 = tpu.matmul %9, %28, %cst_23 {dimension_numbers = #tpu.dot_dimension_numbers<[2], [1], [1], [2], [0, 0, 0, 1, 1, 2], [0], [0]>} : vector<8x8x32xbf16>, vector<8x32x8xbf16>, vector<8x8x8xf32> -> vector<8x8x8xf32>
    "tpu.trace_stop"() : () -> ()
    %c0_24 = arith.constant 0 : index
    %c0_25 = arith.constant 0 : index
    %c0_26 = arith.constant 0 : index
    %c0_27 = arith.constant 0 : index
    %30 = vector.load %arg8[%c0_24, %c0_25, %c0_26, %c0_27] : memref<1x8x1x8xf32, #tpu.memory_space<vmem>>, vector<1x8x1x8xf32>
    %31 = vector.shape_cast %30 : vector<1x8x1x8xf32> to vector<8x1x8xf32>
    %32 = vector.broadcast %31 : vector<8x1x8xf32> to vector<8x8x8xf32>
    %33 = arith.addf %29, %32 : vector<8x8x8xf32>
    %34 = arith.truncf %17 : vector<8x8x8xf32> to vector<8x8x8xbf16>
    %35 = arith.truncf %25 : vector<8x8x8xf32> to vector<8x8x8xbf16>
    "tpu.trace_start"() <{level = 10 : i32, message = "nqd,nkd->nqk"}> : () -> ()
    %cst_28 = arith.constant dense<0.000000e+00> : vector<8x8x8xf32>
    %36 = tpu.matmul %34, %35, %cst_28 {dimension_numbers = #tpu.dot_dimension_numbers<[2], [2], [1], [1], [0, 0, 0, 1, 1, 1], [0], [0]>} : vector<8x8x8xbf16>, vector<8x8x8xbf16>, vector<8x8x8xf32> -> vector<8x8x8xf32>
    "tpu.trace_stop"() : () -> ()
    %cst_29 = arith.constant 0.353553385 : f32
    %37 = vector.broadcast %cst_29 : f32 to vector<8x8x8xf32>
    %38 = arith.mulf %36, %37 : vector<8x8x8xf32>
    %cst_30 = arith.constant dense<0xFF800000> : vector<8x8xf32>
    %39 = vector.multi_reduction <maximumf>, %38, %cst_30 [2] : vector<8x8x8xf32> to vector<8x8xf32>
    %40 = vector.shape_cast %39 : vector<8x8xf32> to vector<8x8x1xf32>
    %41 = vector.broadcast %40 : vector<8x8x1xf32> to vector<8x8x8xf32>
    %42 = arith.subf %38, %41 : vector<8x8x8xf32>
    %43 = math.exp %42 : vector<8x8x8xf32>
    %cst_31 = arith.constant dense<0.000000e+00> : vector<8x8xf32>
    %44 = vector.multi_reduction <add>, %43, %cst_31 [2] : vector<8x8x8xf32> to vector<8x8xf32>
    %45 = vector.shape_cast %44 : vector<8x8xf32> to vector<8x8x1xf32>
    %46 = tpu.reciprocal %45 {approx = true} : vector<8x8x1xf32> -> vector<8x8x1xf32>
    %47 = vector.broadcast %46 : vector<8x8x1xf32> to vector<8x8x8xf32>
    %48 = arith.mulf %43, %47 : vector<8x8x8xf32>
    %49 = arith.truncf %48 : vector<8x8x8xf32> to vector<8x8x8xbf16>
    %50 = arith.truncf %33 : vector<8x8x8xf32> to vector<8x8x8xbf16>
    "tpu.trace_start"() <{level = 10 : i32, message = "nqk,nkd->nqd"}> : () -> ()
    %cst_32 = arith.constant dense<0.000000e+00> : vector<8x8x8xf32>
    %51 = tpu.matmul %49, %50, %cst_32 {dimension_numbers = #tpu.dot_dimension_numbers<[2], [1], [1], [2], [0, 0, 0, 1, 1, 2], [0], [0]>} : vector<8x8x8xbf16>, vector<8x8x8xbf16>, vector<8x8x8xf32> -> vector<8x8x8xf32>
    "tpu.trace_stop"() : () -> ()
    %52 = arith.truncf %51 : vector<8x8x8xf32> to vector<8x8x8xbf16>
    %c0_33 = arith.constant 0 : index
    %c0_34 = arith.constant 0 : index
    %c0_35 = arith.constant 0 : index
    %c0_36 = arith.constant 0 : index
    %53 = vector.load %arg9[%c0_33, %c0_34, %c0_35, %c0_36] : memref<1x8x8x32xf32, #tpu.memory_space<vmem>>, vector<1x8x8x32xf32>
    %54 = vector.shape_cast %53 : vector<1x8x8x32xf32> to vector<8x8x32xf32>
    %55 = arith.truncf %54 : vector<8x8x32xf32> to vector<8x8x32xbf16>
    "tpu.trace_start"() <{level = 10 : i32, message = "nsf,nfd->nsd"}> : () -> ()
    %cst_37 = arith.constant dense<0.000000e+00> : vector<8x8x32xf32>
    %56 = tpu.matmul %52, %55, %cst_37 {dimension_numbers = #tpu.dot_dimension_numbers<[2], [1], [1], [2], [0, 0, 0, 1, 1, 2], [0], [0]>} : vector<8x8x8xbf16>, vector<8x8x32xbf16>, vector<8x8x32xf32> -> vector<8x8x32xf32>
    "tpu.trace_stop"() : () -> ()
    %57 = vector.shape_cast %56 : vector<8x8x32xf32> to vector<2x4x8x32xf32>
    %cst_38 = arith.constant dense<0.000000e+00> : vector<2x8x32xf32>
    %58 = vector.multi_reduction <add>, %57, %cst_38 [1] : vector<2x4x8x32xf32> to vector<2x8x32xf32>
    %59 = vector.shape_cast %58 : vector<2x8x32xf32> to vector<16x32xf32>
    %c0_39 = arith.constant 0 : index
    %c0_40 = arith.constant 0 : index
    %c0_41 = arith.constant 0 : index
    %60 = vector.load %arg10[%c0_39, %c0_40, %c0_41] : memref<1x1x32xf32, #tpu.memory_space<vmem>>, vector<1x1x32xf32>
    %61 = vector.shape_cast %60 : vector<1x1x32xf32> to vector<1x32xf32>
    %62 = vector.broadcast %61 : vector<1x32xf32> to vector<16x32xf32>
    %63 = arith.addf %59, %62 : vector<16x32xf32>
    %64 = arith.addf %3, %63 : vector<16x32xf32>
    %c0_42 = arith.constant 0 : index
    %c0_43 = arith.constant 0 : index
    %c0_44 = arith.constant 0 : index
    %65 = vector.load %arg11[%c0_42, %c0_43, %c0_44] : memref<1x1x32xf32, #tpu.memory_space<vmem>>, vector<1x1x32xf32>
    %66 = vector.shape_cast %65 : vector<1x1x32xf32> to vector<1x32xf32>
    %c0_45 = arith.constant 0 : index
    %c0_46 = arith.constant 0 : index
    %c0_47 = arith.constant 0 : index
    %67 = vector.load %arg12[%c0_45, %c0_46, %c0_47] : memref<1x1x32xf32, #tpu.memory_space<vmem>>, vector<1x1x32xf32>
    %68 = vector.shape_cast %67 : vector<1x1x32xf32> to vector<1x32xf32>
    %cst_48 = arith.constant dense<0.000000e+00> : vector<16xf32>
    %69 = vector.multi_reduction <add>, %64, %cst_48 [1] : vector<16x32xf32> to vector<16xf32>
    %70 = vector.shape_cast %69 : vector<16xf32> to vector<16x1xf32>
    %cst_49 = arith.constant 3.200000e+01 : f32
    %71 = vector.broadcast %cst_49 : f32 to vector<16x1xf32>
    %72 = arith.divf %70, %71 : vector<16x1xf32>
    %73 = vector.broadcast %72 : vector<16x1xf32> to vector<16x32xf32>
    %74 = arith.subf %64, %73 : vector<16x32xf32>
    %75 = arith.mulf %74, %74 : vector<16x32xf32>
    %cst_50 = arith.constant dense<0.000000e+00> : vector<16xf32>
    %76 = vector.multi_reduction <add>, %75, %cst_50 [1] : vector<16x32xf32> to vector<16xf32>
    %77 = vector.shape_cast %76 : vector<16xf32> to vector<16x1xf32>
    %cst_51 = arith.constant 3.200000e+01 : f32
    %78 = vector.broadcast %cst_51 : f32 to vector<16x1xf32>
    %79 = arith.divf %77, %78 : vector<16x1xf32>
    %80 = vector.broadcast %72 : vector<16x1xf32> to vector<16x32xf32>
    %81 = arith.subf %64, %80 : vector<16x32xf32>
    %cst_52 = arith.constant 9.99999974E-6 : f32
    %82 = vector.broadcast %cst_52 : f32 to vector<16x1xf32>
    %83 = arith.addf %79, %82 : vector<16x1xf32>
    %84 = math.rsqrt %83 : vector<16x1xf32>
    %85 = vector.broadcast %84 : vector<16x1xf32> to vector<16x32xf32>
    %86 = arith.mulf %81, %85 : vector<16x32xf32>
    %87 = vector.broadcast %66 : vector<1x32xf32> to vector<16x32xf32>
    %88 = arith.mulf %86, %87 : vector<16x32xf32>
    %89 = vector.broadcast %68 : vector<1x32xf32> to vector<16x32xf32>
    %90 = arith.addf %88, %89 : vector<16x32xf32>
    %91 = arith.truncf %90 : vector<16x32xf32> to vector<16x32xbf16>
    %c0_53 = arith.constant 0 : index
    %c0_54 = arith.constant 0 : index
    %c0_55 = arith.constant 0 : index
    %92 = vector.load %arg13[%c0_53, %c0_54, %c0_55] : memref<1x32x64xf32, #tpu.memory_space<vmem>>, vector<1x32x64xf32>
    %93 = vector.shape_cast %92 : vector<1x32x64xf32> to vector<32x64xf32>
    %94 = arith.truncf %93 : vector<32x64xf32> to vector<32x64xbf16>
    %cst_56 = arith.constant dense<0.000000e+00> : vector<16x64xf32>
    %95 = tpu.matmul %91, %94, %cst_56 {dimension_numbers = #tpu.dot_dimension_numbers<[1], [0], [0], [1], [0, 0, 1, 1], [], []>} : vector<16x32xbf16>, vector<32x64xbf16>, vector<16x64xf32> -> vector<16x64xf32>
    %c0_57 = arith.constant 0 : index
    %c0_58 = arith.constant 0 : index
    %c0_59 = arith.constant 0 : index
    %96 = vector.load %arg14[%c0_57, %c0_58, %c0_59] : memref<1x1x64xf32, #tpu.memory_space<vmem>>, vector<1x1x64xf32>
    %97 = vector.shape_cast %96 : vector<1x1x64xf32> to vector<1x64xf32>
    %98 = vector.broadcast %97 : vector<1x64xf32> to vector<16x64xf32>
    %99 = arith.addf %95, %98 : vector<16x64xf32>
    %cst_60 = arith.constant 0.000000e+00 : f32
    %100 = vector.broadcast %cst_60 : f32 to vector<16x64xf32>
    %101 = arith.maximumf %99, %100 : vector<16x64xf32>
    %102 = arith.truncf %101 : vector<16x64xf32> to vector<16x64xbf16>
    %c0_61 = arith.constant 0 : index
    %c0_62 = arith.constant 0 : index
    %c0_63 = arith.constant 0 : index
    %103 = vector.load %arg15[%c0_61, %c0_62, %c0_63] : memref<1x64x32xf32, #tpu.memory_space<vmem>>, vector<1x64x32xf32>
    %104 = vector.shape_cast %103 : vector<1x64x32xf32> to vector<64x32xf32>
    %105 = arith.truncf %104 : vector<64x32xf32> to vector<64x32xbf16>
    %cst_64 = arith.constant dense<0.000000e+00> : vector<16x32xf32>
    %106 = tpu.matmul %102, %105, %cst_64 {dimension_numbers = #tpu.dot_dimension_numbers<[1], [0], [0], [1], [0, 0, 1, 1], [], []>} : vector<16x64xbf16>, vector<64x32xbf16>, vector<16x32xf32> -> vector<16x32xf32>
    %c0_65 = arith.constant 0 : index
    %c0_66 = arith.constant 0 : index
    %c0_67 = arith.constant 0 : index
    %107 = vector.load %arg16[%c0_65, %c0_66, %c0_67] : memref<1x1x32xf32, #tpu.memory_space<vmem>>, vector<1x1x32xf32>
    %108 = vector.shape_cast %107 : vector<1x1x32xf32> to vector<1x32xf32>
    %109 = vector.broadcast %108 : vector<1x32xf32> to vector<16x32xf32>
    %110 = arith.addf %106, %109 : vector<16x32xf32>
    %111 = arith.addf %90, %110 : vector<16x32xf32>
    %c0_68 = arith.constant 0 : index
    %c0_69 = arith.constant 0 : index
    %c0_70 = arith.constant 0 : index
    %112 = vector.load %arg17[%c0_68, %c0_69, %c0_70] : memref<1x1x32xf32, #tpu.memory_space<vmem>>, vector<1x1x32xf32>
    %113 = vector.shape_cast %112 : vector<1x1x32xf32> to vector<1x32xf32>
    %c0_71 = arith.constant 0 : index
    %c0_72 = arith.constant 0 : index
    %c0_73 = arith.constant 0 : index
    %114 = vector.load %arg18[%c0_71, %c0_72, %c0_73] : memref<1x1x32xf32, #tpu.memory_space<vmem>>, vector<1x1x32xf32>
    %115 = vector.shape_cast %114 : vector<1x1x32xf32> to vector<1x32xf32>
    %cst_74 = arith.constant dense<0.000000e+00> : vector<16xf32>
    %116 = vector.multi_reduction <add>, %111, %cst_74 [1] : vector<16x32xf32> to vector<16xf32>
    %117 = vector.shape_cast %116 : vector<16xf32> to vector<16x1xf32>
    %cst_75 = arith.constant 3.200000e+01 : f32
    %118 = vector.broadcast %cst_75 : f32 to vector<16x1xf32>
    %119 = arith.divf %117, %118 : vector<16x1xf32>
    %120 = vector.broadcast %119 : vector<16x1xf32> to vector<16x32xf32>
    %121 = arith.subf %111, %120 : vector<16x32xf32>
    %122 = arith.mulf %121, %121 : vector<16x32xf32>
    %cst_76 = arith.constant dense<0.000000e+00> : vector<16xf32>
    %123 = vector.multi_reduction <add>, %122, %cst_76 [1] : vector<16x32xf32> to vector<16xf32>
    %124 = vector.shape_cast %123 : vector<16xf32> to vector<16x1xf32>
    %cst_77 = arith.constant 3.200000e+01 : f32
    %125 = vector.broadcast %cst_77 : f32 to vector<16x1xf32>
    %126 = arith.divf %124, %125 : vector<16x1xf32>
    %127 = vector.broadcast %119 : vector<16x1xf32> to vector<16x32xf32>
    %128 = arith.subf %111, %127 : vector<16x32xf32>
    %cst_78 = arith.constant 9.99999974E-6 : f32
    %129 = vector.broadcast %cst_78 : f32 to vector<16x1xf32>
    %130 = arith.addf %126, %129 : vector<16x1xf32>
    %131 = math.rsqrt %130 : vector<16x1xf32>
    %132 = vector.broadcast %131 : vector<16x1xf32> to vector<16x32xf32>
    %133 = arith.mulf %128, %132 : vector<16x32xf32>
    %134 = vector.broadcast %113 : vector<1x32xf32> to vector<16x32xf32>
    %135 = arith.mulf %133, %134 : vector<16x32xf32>
    %136 = vector.broadcast %115 : vector<1x32xf32> to vector<16x32xf32>
    %137 = arith.addf %135, %136 : vector<16x32xf32>
    %c0_79 = arith.constant 0 : index
    %c0_80 = arith.constant 0 : index
    %138 = vector.load %arg20[%c0_79, %c0_80] : memref<16x32xf32, #tpu.memory_space<vmem>>, vector<16x32xf32>
    tpu.vector_store %arg20[%c0_79, %c0_80], %137 {strides = array<i32>} : memref<16x32xf32, #tpu.memory_space<vmem>>, vector<16x32xf32>,
    %c0_81 = arith.constant 0 : index
    %c0_82 = arith.constant 0 : index
    %139 = vector.load %arg19[%c0_81, %c0_82] : memref<16x32xf32, #tpu.memory_space<vmem>>, vector<16x32xf32>
    tpu.vector_store %arg19[%c0_81, %c0_82], %137 {strides = array<i32>} : memref<16x32xf32, #tpu.memory_space<vmem>>, vector<16x32xf32>,
    return
  }
  func.func @transform_0(%arg0: i32) -> (i32, i32) {
    %c0_i32 = arith.constant 0 : i32
    %c0_i32_0 = arith.constant 0 : i32
    %c0_i32_1 = arith.constant 0 : i32
    return %c0_i32, %c0_i32_0 : i32, i32
  }
  func.func @transform_1(%arg0: i32) -> (i32, i32) {
    %c0_i32 = arith.constant 0 : i32
    %c0_i32_0 = arith.constant 0 : i32
    %c0_i32_1 = arith.constant 0 : i32
    return %c0_i32, %c0_i32_0 : i32, i32
  }
  func.func @transform_2(%arg0: i32) -> (i32, i32, i32, i32) {
    %c0_i32 = arith.constant 0 : i32
    %c0_i32_0 = arith.constant 0 : i32
    %c0_i32_1 = arith.constant 0 : i32
    %c0_i32_2 = arith.constant 0 : i32
    return %arg0, %c0_i32, %c0_i32_0, %c0_i32_1 : i32, i32, i32, i32
  }
  func.func @transform_3(%arg0: i32) -> (i32, i32, i32, i32) {
    %c0_i32 = arith.constant 0 : i32
    %c0_i32_0 = arith.constant 0 : i32
    %c0_i32_1 = arith.constant 0 : i32
    %c0_i32_2 = arith.constant 0 : i32
    return %arg0, %c0_i32, %c0_i32_0, %c0_i32_1 : i32, i32, i32, i32
  }
  func.func @transform_4(%arg0: i32) -> (i32, i32, i32, i32) {
    %c0_i32 = arith.constant 0 : i32
    %c0_i32_0 = arith.constant 0 : i32
    %c0_i32_1 = arith.constant 0 : i32
    %c0_i32_2 = arith.constant 0 : i32
    return %arg0, %c0_i32, %c0_i32_0, %c0_i32_1 : i32, i32, i32, i32
  }
  func.func @transform_5(%arg0: i32) -> (i32, i32, i32, i32) {
    %c0_i32 = arith.constant 0 : i32
    %c0_i32_0 = arith.constant 0 : i32
    %c0_i32_1 = arith.constant 0 : i32
    %c0_i32_2 = arith.constant 0 : i32
    return %arg0, %c0_i32, %c0_i32_0, %c0_i32_1 : i32, i32, i32, i32
  }
  func.func @transform_6(%arg0: i32) -> (i32, i32, i32, i32) {
    %c0_i32 = arith.constant 0 : i32
    %c0_i32_0 = arith.constant 0 : i32
    %c0_i32_1 = arith.constant 0 : i32
    %c0_i32_2 = arith.constant 0 : i32
    return %arg0, %c0_i32, %c0_i32_0, %c0_i32_1 : i32, i32, i32, i32
  }
  func.func @transform_7(%arg0: i32) -> (i32, i32, i32, i32) {
    %c0_i32 = arith.constant 0 : i32
    %c0_i32_0 = arith.constant 0 : i32
    %c0_i32_1 = arith.constant 0 : i32
    %c0_i32_2 = arith.constant 0 : i32
    return %arg0, %c0_i32, %c0_i32_0, %c0_i32_1 : i32, i32, i32, i32
  }
  func.func @transform_8(%arg0: i32) -> (i32, i32, i32, i32) {
    %c0_i32 = arith.constant 0 : i32
    %c0_i32_0 = arith.constant 0 : i32
    %c0_i32_1 = arith.constant 0 : i32
    %c0_i32_2 = arith.constant 0 : i32
    return %arg0, %c0_i32, %c0_i32_0, %c0_i32_1 : i32, i32, i32, i32
  }
  func.func @transform_9(%arg0: i32) -> (i32, i32, i32) {
    %c0_i32 = arith.constant 0 : i32
    %c0_i32_0 = arith.constant 0 : i32
    %c0_i32_1 = arith.constant 0 : i32
    return %arg0, %c0_i32, %c0_i32_0 : i32, i32, i32
  }
  func.func @transform_10(%arg0: i32) -> (i32, i32, i32) {
    %c0_i32 = arith.constant 0 : i32
    %c0_i32_0 = arith.constant 0 : i32
    %c0_i32_1 = arith.constant 0 : i32
    return %arg0, %c0_i32, %c0_i32_0 : i32, i32, i32
  }
  func.func @transform_11(%arg0: i32) -> (i32, i32, i32) {
    %c0_i32 = arith.constant 0 : i32
    %c0_i32_0 = arith.constant 0 : i32
    %c0_i32_1 = arith.constant 0 : i32
    return %arg0, %c0_i32, %c0_i32_0 : i32, i32, i32
  }
  func.func @transform_12(%arg0: i32) -> (i32, i32, i32) {
    %c0_i32 = arith.constant 0 : i32
    %c0_i32_0 = arith.constant 0 : i32
    %c0_i32_1 = arith.constant 0 : i32
    return %arg0, %c0_i32, %c0_i32_0 : i32, i32, i32
  }
  func.func @transform_13(%arg0: i32) -> (i32, i32, i32) {
    %c0_i32 = arith.constant 0 : i32
    %c0_i32_0 = arith.constant 0 : i32
    %c0_i32_1 = arith.constant 0 : i32
    return %arg0, %c0_i32, %c0_i32_0 : i32, i32, i32
  }
  func.func @transform_14(%arg0: i32) -> (i32, i32, i32) {
    %c0_i32 = arith.constant 0 : i32
    %c0_i32_0 = arith.constant 0 : i32
    %c0_i32_1 = arith.constant 0 : i32
    return %arg0, %c0_i32, %c0_i32_0 : i32, i32, i32
  }
  func.func @transform_15(%arg0: i32) -> (i32, i32, i32) {
    %c0_i32 = arith.constant 0 : i32
    %c0_i32_0 = arith.constant 0 : i32
    %c0_i32_1 = arith.constant 0 : i32
    return %arg0, %c0_i32, %c0_i32_0 : i32, i32, i32
  }
  func.func @transform_16(%arg0: i32) -> (i32, i32, i32) {
    %c0_i32 = arith.constant 0 : i32
    %c0_i32_0 = arith.constant 0 : i32
    %c0_i32_1 = arith.constant 0 : i32
    return %arg0, %c0_i32, %c0_i32_0 : i32, i32, i32
  }
  func.func @transform_17(%arg0: i32) -> (i32, i32, i32) {
    %c0_i32 = arith.constant 0 : i32
    %c0_i32_0 = arith.constant 0 : i32
    %c0_i32_1 = arith.constant 0 : i32
    return %arg0, %c0_i32, %c0_i32_0 : i32, i32, i32
  }
  func.func @transform_18(%arg0: i32) -> (i32, i32) {
    %c0_i32 = arith.constant 0 : i32
    %c0_i32_0 = arith.constant 0 : i32
    %c0_i32_1 = arith.constant 0 : i32
    return %c0_i32, %c0_i32_0 : i32, i32
  }
}

</mosaic_0001>

<bundles_post_ra>
// kernel: fused_encoder_stack.1
= control target key start
LH: loop header
LB: loop body
LE: loop exit
PB: predicated region body
PF: predicated region fallthrough
CT: control target
= control target key end

     0   :  { %s5288_s0 = inlined_call_operand.vmem [shape: f32[16,32], index: 0, kind: input, shape index: {}]   ;;  %s5289_s1 = inlined_call_operand.vmem [shape: f32[16,32], index: 1, kind: input, shape index: {}]   ;;  %s5290_s2 = inlined_call_operand.vmem [shape: f32[2,8,32,8], index: 2, kind: input, shape index: {}]   ;;  %s5291_s3 = inlined_call_operand.vmem [shape: f32[2,8,32,8], index: 3, kind: input, shape index: {}]   ;;  %s5292_s4 = inlined_call_operand.vmem [shape: f32[2,8,32,8], index: 4, kind: input, shape index: {}]   ;;  %s5293_s5 = inlined_call_operand.vmem [shape: f32[2,8,1,8], index: 5, kind: input, shape index: {}]   ;;  %s5294_s6 = inlined_call_operand.vmem [shape: f32[2,8,1,8], index: 6, kind: input, shape index: {}]   ;;  %s5295_s7 = inlined_call_operand.vmem [shape: f32[2,8,1,8], index: 7, kind: input, shape index: {}]   ;;  %s5296_s8 = inlined_call_operand.vmem [shape: f32[2,8,8,32], index: 8, kind: input, shape index: {}]   ;;  %s5297_s9 = inlined_call_operand.vmem [shape: f32[2,1,32], index: 9, kind: input, shape index: {}]   ;;  %s5298_s10 = inlined_call_operand.vmem [shape: f32[2,1,32], index: 10, kind: input, shape index: {}]   ;;  %s5299_s11 = inlined_call_operand.vmem [shape: f32[2,1,32], index: 11, kind: input, shape index: {}]   ;;  %s5300_s12 = inlined_call_operand.vmem [shape: f32[2,32,64], index: 12, kind: input, shape index: {}]   ;;  %s5301_s13 = inlined_call_operand.vmem [shape: f32[2,1,64], index: 13, kind: input, shape index: {}]   ;;  %s5302_s14 = inlined_call_operand.vmem [shape: f32[2,64,32], index: 14, kind: input, shape index: {}]   ;;  %s5303_s15 = inlined_call_operand.vmem [shape: f32[2,1,32], index: 15, kind: input, shape index: {}]   ;;  %s5304_s16 = inlined_call_operand.vmem [shape: f32[2,1,32], index: 16, kind: input, shape index: {}]   ;;  %s5305_s17 = inlined_call_operand.vmem [shape: f32[2,1,32], index: 17, kind: input, shape index: {}]   ;;  %s5306_s18 = inlined_call_operand.hbm [shape: f32[16,32], index: 18, kind: output, shape index: {}]  }
   0x1   :  { %5316 = sst [smem:[#allocation11_spill]] %s5288_s0 }
   0x2   :  { %5317 = sst [smem:[#allocation12_spill]] %s5289_s1 }
   0x3   :  { %5318 = sst [smem:[#allocation13_spill]] %s5290_s2 }
   0x4   :  { %5319 = sst [smem:[#allocation14_spill]] %s5291_s3 }
   0x5   :  { %5320 = sst [smem:[#allocation15_spill]] %s5292_s4 }
   0x6   :  { %5321 = sst [smem:[#allocation16_spill]] %s5293_s5 }
   0x7   :  { %5322 = sst [smem:[#allocation17_spill]] %s5294_s6 }
   0x8   :  { %5323 = sst [smem:[#allocation18_spill]] %s5295_s7 }
   0x9   :  { %5324 = sst [smem:[#allocation19_spill]] %s5296_s8 }
   0xa   :  { %5325 = sst [smem:[#allocation20_spill]] %s5300_s12 }
   0xb   :  { %5326 = sst [smem:[#allocation21_spill]] %s5306_s18 }
   0xc   :  { %23 = vsyncpa [#allocation4], 0  ;;  %s4612_s27 = smov 0  }
   0xd LB: > { %5327 = sst [smem:[#allocation6_spill]] %s4510_s27  ;;  %s4618_s28 = sadd.s32 4294967295, %s4510_s27   ;;  %s4510_s27 = sphi %s4612_s27, %s29_s27  }
   0xe   : > { %5328 = sst [smem:[#allocation7_spill]] %s4618_s28  ;;  %p3821_p0 = scmp.ge.s32.totalorder %s4510_s27, 1 }
   0xf   : > { %p641_p1 = scmp.lt.s32.totalorder %s4510_s27, 3 }
  0x11   : > { %p642_p2 = pnand %p3821_p0, %p641_p1 }
  0x13   : > { %645 = sbr.rel (%p642_p2) target bundleno = 2404 (0x964), region = 92 }
  0x1a   : > { %p748_p3 = scmp.lt.s32.totalorder %s4618_s28, 1  ;;  %s5329_s20 = sld [smem:[#allocation13_spill]] }
  0x1b   : > { %s5330_s3 = sld [smem:[#allocation14_spill]]  ;;  %s5332_s4 = sld [smem:[#allocation15_spill]] }
  0x1c   : > { %s4624_s29 = scalar_select %p748_p3, %s4618_s28, 1 }
  0x1d   : > { %s5334_s5 = sld [smem:[#allocation16_spill]]  ;;  %s5335_s6 = sld [smem:[#allocation17_spill]] }
  0x1e   : > { %s3923_s30 = sshll.u32 %s4624_s29, 8  ;;  %s3828_s0 = sshll.u32 %s4624_s29, 3 }
  0x1f   : > { %s5336_s7 = sld [smem:[#allocation18_spill]]  ;;  %s5338_s8 = sld [smem:[#allocation19_spill]] }
  0x20   : > { %s4631_s21 = scalar_lea.vmem %s5329_s20, %s3923_s30  ;;  %s5339_s12 = sld [smem:[#allocation20_spill]] }
  0x21   : > { %s4636_s23 = scalar_lea.vmem %s5330_s3, %s3923_s30  ;;  %s4641_s26 = scalar_lea.vmem %s5332_s4, %s3923_s30 }
  0x22   : > { %5331 = sst [smem:[#allocation8_spill]] %s4636_s23  ;;  %s3926_s23 = sshll.u32 %s4624_s29, 6 }
  0x23   : > { %5333 = sst [smem:[#allocation9_spill]] %s4641_s26  ;;  %s4646_s28 = scalar_lea.vmem %s5334_s5, %s3828_s0 }
  0x24   : > { %s4651_s20 = scalar_lea.vmem %s5335_s6, %s3828_s0  ;;  %s804_s6 = scalar_lea.vmem %s5303_s15, %s4624_s29 }
  0x25   : > { %s4656_s3 = scalar_lea.vmem %s5336_s7, %s3828_s0  ;;  %s4666_s18 = scalar_lea.vmem %s5338_s8, %s3926_s23 }
  0x26   : > { %5337 = sst [smem:[#allocation10_spill]] %s4656_s3  ;;  %s3927_s0 = sshll.u32 %s4624_s29, 5 }
  0x27   : > { %s4680_s3 = scalar_lea.vmem %s5339_s12, %s3927_s0  ;;  %s4689_s8 = scalar_lea.vmem %s5302_s14, %s3926_s23 }
  0x28   : > { %s807_s19 = scalar_lea.vmem %s5304_s16, %s4624_s29  ;;  %s810_s2 = scalar_lea.vmem %s5305_s17, %s4624_s29 }
  0x29   : > { %s5340_s12 = sld [smem:[#allocation7_spill]] }
  0x2f   : > { %p3837_p4 = scmp.ne.s32.totalorder %s5340_s12, 0 }
  0x30   : > { %s5341_s30 = sld [smem:[#allocation11_spill]] (!%p3837_p4)  ;;  %s5342_s4 = sld [smem:[#allocation12_spill]] (!%p3837_p4)  ;;  %vm822_vm0 = vcmask (!%p3837_p4), 261120  }
  0x31   : > { %815 = sbr.rel (%p3837_p4) target bundleno = 59 (0x3b), region = 96 }
  0x36   : > { %v816_v0 = vld [vmem:[%s5341_s30] sm:$0xff] (!%p3837_p4)  ;;  %v817_v2 = vld [vmem:[%s5341_s30 + $0x8] sm:$0xff] (!%p3837_p4) }
  0x37   : > { %v818_v1 = vld [vmem:[%s5342_s4] sm:$0xff] (!%p3837_p4)  ;;  %v819_v4 = vld [vmem:[%s5342_s4 + $0x8] sm:$0xff] (!%p3837_p4) }
  0x38   : > { %v820_v3 = vadd.f32 %v818_v1, %v816_v0  ;;  %v821_v5 = vadd.f32 %v819_v4, %v817_v2 }
  0x3a   : > { %823 = vst.msk [vmem:[#allocation2] sm:$0xff] %vm822_vm0, %v820_v3  ;;  %824 = vst.msk [vmem:[#allocation2 + $0x8] sm:$0xff] %vm822_vm0, %v821_v5 }
  0x3b PF: > { %v829_v6 = vld [vmem:[%s4631_s21] sm:$0xff]  ;;  %v830_v7 = vld [vmem:[%s4631_s21 + $0x8] sm:$0xff]  ;;  %v4512_v9 = vmov 0.0   ;;  %v831_v12 = vld [vmem:[%s4631_s21 + $0x10] sm:$0xff]  ;;  %vm4513_vm1 = vmmov 0   ;;  %vm933_vm2 = vcmask 261120   ;;  %s5346_s7 = scalar_lea.vmem %s5297_s9, %s4624_s29  ;;  %s5347_s24 = scalar_lea.vmem %s5298_s10, %s4624_s29 }
  0x3c   : > { %v833_v8 = vld [vmem:[%s4631_s21 + $0x20] sm:$0xff]  ;;  %4057 = vmatprep.subr.bf16.mxu0 %v4512_v9  ;;  %4065 = vmatprep.subr.bf16.mxu1 %v4512_v9  ;;  %v861_v10 = vpack.c.bf16 %v830_v7, %v829_v6  ;;  %v834_v11 = vld [vmem:[%s4631_s21 + $0x28] sm:$0xff]  ;;  %v832_v13 = vld [vmem:[%s4631_s21 + $0x18] sm:$0xff]  ;;  %s5343_s12 = sld [smem:[#allocation8_spill]]  ;;  %vm2124_vm3 = vcmask 64512   ;;  %vm2608_vm4 = vcmask 1043456   ;;  %s5348_s26 = scalar_lea.vmem %s5299_s11, %s4624_s29 }
  0x3d   : > { %v863_v14 = vpack.c.bf16 %v834_v11, %v833_v8  ;;  %v835_v15 = vld [vmem:[%s4631_s21 + $0x30] sm:$0xff]  ;;  %v836_v16 = vld [vmem:[%s4631_s21 + $0x38] sm:$0xff]  ;;  %4061 = vmatprep.mubr.msk.bf16.mxu0 %vm4513_vm1, %v4512_v9  ;;  %4069 = vmatprep.mubr.msk.bf16.mxu1 %vm4513_vm1, %v4512_v9  ;;  %v862_v17 = vpack.c.bf16 %v832_v13, %v831_v12  ;;  %v837_v20 = vld [vmem:[%s4631_s21 + $0x40] sm:$0xff]  ;;  %s5349_s22 = scalar_lea.vmem %s5301_s13, %s4624_s29  ;;  %vm3516_vm5 = vcmask 523264  }
  0x3e   : > { %4058 = vmatpush3.bf16.msra.mxu0 %v861_v10  ;;  %v864_v19 = vpack.c.bf16 %v836_v16, %v835_v15  ;;  %v838_v21 = vld [vmem:[%s4631_s21 + $0x48] sm:$0xff]  ;;  %v841_v22 = vld [vmem:[%s4631_s21 + $0x60] sm:$0xff]  ;;  %v839_v27 = vld [vmem:[%s4631_s21 + $0x50] sm:$0xff] }
  0x3f   : > { %4066 = vmatpush3.bf16.msra.mxu1 %v863_v14  ;;  %4059 = vmatprep.subr.bf16.mxu0 %v4512_v9  ;;  %v842_v23 = vld [vmem:[%s4631_s21 + $0x68] sm:$0xff]  ;;  %v865_v25 = vpack.c.bf16 %v838_v21, %v837_v20  ;;  %v840_v28 = vld [vmem:[%s4631_s21 + $0x58] sm:$0xff]  ;;  %v843_v29 = vld [vmem:[%s4631_s21 + $0x70] sm:$0xff] }
  0x40   : > { %4067 = vmatprep.subr.bf16.mxu1 %v4512_v9  ;;  %v867_v26 = vpack.c.bf16 %v842_v23, %v841_v22  ;;  %v844_v30 = vld [vmem:[%s4631_s21 + $0x78] sm:$0xff]  ;;  %v866_v31 = vpack.c.bf16 %v840_v28, %v839_v27  ;;  %v845_v33 = vld [vmem:[%s4631_s21 + $0x80] sm:$0xff]  ;;  %v846_v34 = vld [vmem:[%s4631_s21 + $0x88] sm:$0xff] }
  0x41   : > { %v825_v18 = vld [vmem:[#allocation2] sm:$0xff]  ;;  %v868_v32 = vpack.c.bf16 %v844_v30, %v843_v29  ;;  %v850_v36 = vld [vmem:[%s4631_s21 + $0xa8] sm:$0xff]  ;;  %v869_v37 = vpack.c.bf16 %v846_v34, %v845_v33  ;;  %v847_v39 = vld [vmem:[%s4631_s21 + $0x90] sm:$0xff] }
  0x42   : > { %v4736_v24 = vpack.c.bf16 %v825_v18, %v825_v18  ;;  %4060 = vmatpush3.bf16.msra.mxu0 %v862_v17  ;;  %v849_v35 = vld [vmem:[%s4631_s21 + $0xa0] sm:$0xff]  ;;  %v848_v40 = vld [vmem:[%s4631_s21 + $0x98] sm:$0xff]  ;;  %v851_v41 = vld [vmem:[%s4631_s21 + $0xb0] sm:$0xff] }
  0x43   : > { %4068 = vmatpush3.bf16.msra.mxu1 %v864_v19  ;;  %4073 = vmatprep.subr.bf16.mxu0 %v4512_v9  ;;  %v871_v38 = vpack.c.bf16 %v850_v36, %v849_v35  ;;  %v852_v42 = vld [vmem:[%s4631_s21 + $0xb8] sm:$0xff]  ;;  %v870_v43 = vpack.c.bf16 %v848_v40, %v847_v39  ;;  %v826_v44 = vld [vmem:[#allocation2 + $0x8] sm:$0xff]  ;;  %v853_v46 = vld [vmem:[%s4631_s21 + $0xc0] sm:$0xff] }
  0x44   : > { %4081 = vmatprep.subr.bf16.mxu1 %v4512_v9  ;;  %v872_v45 = vpack.c.bf16 %v852_v42, %v851_v41  ;;  %v854_v47 = vld [vmem:[%s4631_s21 + $0xc8] sm:$0xff]  ;;  %v857_v48 = vld [vmem:[%s4631_s21 + $0xe0] sm:$0xff]  ;;  %v4778_v50 = vpack.c.bf16 %v826_v44, %v826_v44  ;;  %v855_v53 = vld [vmem:[%s4631_s21 + $0xd0] sm:$0xff] }
  0x45   : > { %4062 = vmatmul.mubr.msk.bf16.vlgmr.msra.gmra.mrb[0].mxu0 %vm933_vm2, %v4736_v24  ;;  %v858_v49 = vld [vmem:[%s4631_s21 + $0xe8] sm:$0xff]  ;;  %v873_v51 = vpack.c.bf16 %v854_v47, %v853_v46  ;;  %v856_v54 = vld [vmem:[%s4631_s21 + $0xd8] sm:$0xff]  ;;  %v859_v55 = vld [vmem:[%s4631_s21 + $0xf0] sm:$0xff] }
  0x46   : > { %4070 = vmatmul.mubr.msk.bf16.vlgmr.msra.gmra.mrb[0].mxu1 %vm933_vm2, %v4736_v24  ;;  %4074 = vmatpush3.bf16.msra.mxu0 %v865_v25  ;;  %v875_v52 = vpack.c.bf16 %v858_v49, %v857_v48  ;;  %v860_v56 = vld [vmem:[%s4631_s21 + $0xf8] sm:$0xff]  ;;  %v874_v57 = vpack.c.bf16 %v856_v54, %v855_v53  ;;  %v1260_v59 = vld [vmem:[%s5343_s12] sm:$0xff]  ;;  %v1261_v60 = vld [vmem:[%s5343_s12 + $0x8] sm:$0xff]  ;;  %s5344_s21 = sld [smem:[#allocation9_spill]] }
  0x47   : > { %4082 = vmatpush3.bf16.msra.mxu1 %v867_v26  ;;  %4075 = vmatprep.subr.bf16.mxu0 %v4512_v9  ;;  %v876_v58 = vpack.c.bf16 %v860_v56, %v859_v55  ;;  %v1264_v61 = vld [vmem:[%s5343_s12 + $0x20] sm:$0xff]  ;;  %v1265_v62 = vld [vmem:[%s5343_s12 + $0x28] sm:$0xff]  ;;  %v1292_v63 = vpack.c.bf16 %v1261_v60, %v1260_v59  ;;  %v1262_v1 = vld [vmem:[%s5343_s12 + $0x10] sm:$0xff] }
  0x48   : > { %4083 = vmatprep.subr.bf16.mxu1 %v4512_v9  ;;  %4077 = vmatprep.mubr.msk.bf16.mxu0 %vm4513_vm1, %v4512_v9  ;;  %v1294_v0 = vpack.c.bf16 %v1265_v62, %v1264_v61  ;;  %v1263_v2 = vld [vmem:[%s5343_s12 + $0x18] sm:$0xff]  ;;  %v1266_v3 = vld [vmem:[%s5343_s12 + $0x30] sm:$0xff]  ;;  %v1268_v7 = vld [vmem:[%s5343_s12 + $0x40] sm:$0xff] }
  0x49   : > { %4085 = vmatprep.mubr.msk.bf16.mxu1 %vm4513_vm1, %v4512_v9  ;;  %v1267_v4 = vld [vmem:[%s5343_s12 + $0x38] sm:$0xff]  ;;  %v1293_v5 = vpack.c.bf16 %v1263_v2, %v1262_v1  ;;  %v1269_v8 = vld [vmem:[%s5343_s12 + $0x48] sm:$0xff]  ;;  %v1272_v10 = vld [vmem:[%s5343_s12 + $0x60] sm:$0xff] }
  0x4a   : > { %4076 = vmatpush3.bf16.msra.mxu0 %v866_v31  ;;  %v1295_v6 = vpack.c.bf16 %v1267_v4, %v1266_v3  ;;  %v1273_v11 = vld [vmem:[%s5343_s12 + $0x68] sm:$0xff]  ;;  %v1296_v12 = vpack.c.bf16 %v1269_v8, %v1268_v7  ;;  %v1270_v14 = vld [vmem:[%s5343_s12 + $0x50] sm:$0xff]  ;;  %v1271_v15 = vld [vmem:[%s5343_s12 + $0x58] sm:$0xff] }
  0x4b   : > { %4084 = vmatpush3.bf16.msra.mxu1 %v868_v32  ;;  %4089 = vmatprep.subr.bf16.mxu0 %v4512_v9  ;;  %v1298_v13 = vpack.c.bf16 %v1273_v11, %v1272_v10  ;;  %v1274_v16 = vld [vmem:[%s5343_s12 + $0x70] sm:$0xff]  ;;  %v1275_v17 = vld [vmem:[%s5343_s12 + $0x78] sm:$0xff]  ;;  %v1297_v18 = vpack.c.bf16 %v1271_v15, %v1270_v14  ;;  %v1276_v20 = vld [vmem:[%s5343_s12 + $0x80] sm:$0xff] }
  0x4c   : > { %4097 = vmatprep.subr.bf16.mxu1 %v4512_v9  ;;  %v1299_v19 = vpack.c.bf16 %v1275_v17, %v1274_v16  ;;  %v1277_v21 = vld [vmem:[%s5343_s12 + $0x88] sm:$0xff]  ;;  %v1280_v22 = vld [vmem:[%s5343_s12 + $0xa0] sm:$0xff]  ;;  %v1278_v27 = vld [vmem:[%s5343_s12 + $0x90] sm:$0xff] }
  0x4d   : > { %4078 = vmatmul.mubr.msk.bf16.vlgmr.msra.gmra.mrb[4].mxu0 %vm933_vm2, %v4736_v24  ;;  %v1281_v23 = vld [vmem:[%s5343_s12 + $0xa8] sm:$0xff]  ;;  %v1300_v25 = vpack.c.bf16 %v1277_v21, %v1276_v20  ;;  %v1279_v28 = vld [vmem:[%s5343_s12 + $0x98] sm:$0xff]  ;;  %v1282_v29 = vld [vmem:[%s5343_s12 + $0xb0] sm:$0xff] }
  0x4e   : > { %4086 = vmatmul.mubr.msk.bf16.vlgmr.msra.gmra.mrb[4].mxu1 %vm933_vm2, %v4736_v24  ;;  %4090 = vmatpush3.bf16.msra.mxu0 %v869_v37  ;;  %v1302_v26 = vpack.c.bf16 %v1281_v23, %v1280_v22  ;;  %v1283_v30 = vld [vmem:[%s5343_s12 + $0xb8] sm:$0xff]  ;;  %v1301_v31 = vpack.c.bf16 %v1279_v28, %v1278_v27  ;;  %v1284_v33 = vld [vmem:[%s5343_s12 + $0xc0] sm:$0xff]  ;;  %v1285_v34 = vld [vmem:[%s5343_s12 + $0xc8] sm:$0xff] }
  0x4f   : > { %4098 = vmatpush3.bf16.msra.mxu1 %v871_v38  ;;  %4091 = vmatprep.subr.bf16.mxu0 %v4512_v9  ;;  %v1303_v32 = vpack.c.bf16 %v1283_v30, %v1282_v29  ;;  %v1288_v35 = vld [vmem:[%s5343_s12 + $0xe0] sm:$0xff]  ;;  %v1289_v36 = vld [vmem:[%s5343_s12 + $0xe8] sm:$0xff]  ;;  %v1304_v37 = vpack.c.bf16 %v1285_v34, %v1284_v33  ;;  %v1286_v39 = vld [vmem:[%s5343_s12 + $0xd0] sm:$0xff] }
  0x50   : > { %4099 = vmatprep.subr.bf16.mxu1 %v4512_v9  ;;  %4093 = vmatprep.mubr.msk.bf16.mxu0 %vm4513_vm1, %v4512_v9  ;;  %v1306_v38 = vpack.c.bf16 %v1289_v36, %v1288_v35  ;;  %v1287_v40 = vld [vmem:[%s5343_s12 + $0xd8] sm:$0xff]  ;;  %v1290_v41 = vld [vmem:[%s5343_s12 + $0xf0] sm:$0xff]  ;;  %v1685_v46 = vld [vmem:[%s5344_s21 + $0x8] sm:$0xff] }
  0x51   : > { %4101 = vmatprep.mubr.msk.bf16.mxu1 %vm4513_vm1, %v4512_v9  ;;  %v1291_v42 = vld [vmem:[%s5343_s12 + $0xf8] sm:$0xff]  ;;  %v1688_v48 = vld [vmem:[%s5344_s21 + $0x20] sm:$0xff]  ;;  %v1689_v49 = vld [vmem:[%s5344_s21 + $0x28] sm:$0xff] }
  0x52   : > { %4092 = vmatpush3.bf16.msra.mxu0 %v870_v43  ;;  %v1305_v43 = vpack.c.bf16 %v1287_v40, %v1286_v39  ;;  %v1307_v44 = vpack.c.bf16 %v1291_v42, %v1290_v41  ;;  %v1687_v53 = vld [vmem:[%s5344_s21 + $0x18] sm:$0xff]  ;;  %v1690_v55 = vld [vmem:[%s5344_s21 + $0x30] sm:$0xff]  ;;  %v1693_v59 = vld [vmem:[%s5344_s21 + $0x48] sm:$0xff] }
  0x53   : > { %4100 = vmatpush3.bf16.msra.mxu1 %v872_v45  ;;  %4105 = vmatprep.subr.bf16.mxu0 %v4512_v9  ;;  %v1684_v45 = vld [vmem:[%s5344_s21] sm:$0xff]  ;;  %v1691_v56 = vld [vmem:[%s5344_s21 + $0x38] sm:$0xff]  ;;  %v1697_v62 = vld [vmem:[%s5344_s21 + $0x68] sm:$0xff] }
  0x54   : > { %4113 = vmatprep.subr.bf16.mxu1 %v4512_v9  ;;  %v1716_v47 = vpack.c.bf16 %v1685_v46, %v1684_v45  ;;  %v1696_v61 = vld [vmem:[%s5344_s21 + $0x60] sm:$0xff]  ;;  %v1695_v1 = vld [vmem:[%s5344_s21 + $0x58] sm:$0xff]  ;;  %v1698_v3 = vld [vmem:[%s5344_s21 + $0x70] sm:$0xff] }
  0x55   : > { %4094 = vmatmul.mubr.msk.bf16.vlgmr.msra.gmra.mrb[8].mxu0 %vm933_vm2, %v4778_v50  ;;  %v1699_v4 = vld [vmem:[%s5344_s21 + $0x78] sm:$0xff]  ;;  %v1701_v7 = vld [vmem:[%s5344_s21 + $0x88] sm:$0xff]  ;;  %v1704_v10 = vld [vmem:[%s5344_s21 + $0xa0] sm:$0xff] }
  0x56   : > { %4102 = vmatmul.mubr.msk.bf16.vlgmr.msra.gmra.mrb[8].mxu1 %vm933_vm2, %v4778_v50  ;;  %4106 = vmatpush3.bf16.msra.mxu0 %v873_v51  ;;  %v1718_v51 = vpack.c.bf16 %v1689_v49, %v1688_v48  ;;  %v1705_v11 = vld [vmem:[%s5344_s21 + $0xa8] sm:$0xff]  ;;  %v1703_v14 = vld [vmem:[%s5344_s21 + $0x98] sm:$0xff]  ;;  %v1706_v16 = vld [vmem:[%s5344_s21 + $0xb0] sm:$0xff] }
  0x57   : > { %4114 = vmatpush3.bf16.msra.mxu1 %v875_v52  ;;  %4107 = vmatprep.subr.bf16.mxu0 %v4512_v9  ;;  %v1686_v52 = vld [vmem:[%s5344_s21 + $0x10] sm:$0xff]  ;;  %v1707_v17 = vld [vmem:[%s5344_s21 + $0xb8] sm:$0xff]  ;;  %v1712_v20 = vld [vmem:[%s5344_s21 + $0xe0] sm:$0xff] }
  0x58   : > { %4115 = vmatprep.subr.bf16.mxu1 %v4512_v9  ;;  %4109 = vmatprep.mubr.msk.bf16.mxu0 %vm4513_vm1, %v4512_v9  ;;  %v1717_v54 = vpack.c.bf16 %v1687_v53, %v1686_v52  ;;  %v1713_v22 = vld [vmem:[%s5344_s21 + $0xe8] sm:$0xff]  ;;  %v1714_v28 = vld [vmem:[%s5344_s21 + $0xf0] sm:$0xff]  ;;  %v1715_v29 = vld [vmem:[%s5344_s21 + $0xf8] sm:$0xff] }
  0x59   : > { %4117 = vmatprep.mubr.msk.bf16.mxu1 %vm4513_vm1, %v4512_v9  ;;  %v1730_v23 = vpack.c.bf16 %v1713_v22, %v1712_v20  ;;  %v1731_v30 = vpack.c.bf16 %v1715_v29, %v1714_v28 }
  0x5a   : > { %4108 = vmatpush3.bf16.msra.mxu0 %v874_v57  ;;  %v1719_v57 = vpack.c.bf16 %v1691_v56, %v1690_v55 }
  0x5b   : > { %4116 = vmatpush3.bf16.msra.mxu1 %v876_v58  ;;  %4121 = vmatprep.subr.bf16.mxu0 %v4512_v9  ;;  %v1692_v58 = vld [vmem:[%s5344_s21 + $0x40] sm:$0xff] }
  0x5c   : > { %4129 = vmatprep.subr.bf16.mxu1 %v4512_v9  ;;  %v1720_v60 = vpack.c.bf16 %v1693_v59, %v1692_v58 }
  0x5d   : > { %4110 = vmatmul.mubr.msk.bf16.vlgmr.msra.gmra.mrb[12].mxu0 %vm933_vm2, %v4778_v50 }
  0x5e   : > { %4118 = vmatmul.mubr.msk.bf16.vlgmr.msra.gmra.mrb[12].mxu1 %vm933_vm2, %v4778_v50  ;;  %4122 = vmatpush3.bf16.msra.mxu0 %v1292_v63  ;;  %v1722_v63 = vpack.c.bf16 %v1697_v62, %v1696_v61 }
  0x5f   : > { %4130 = vmatpush3.bf16.msra.mxu1 %v1294_v0  ;;  %4123 = vmatprep.subr.bf16.mxu0 %v4512_v9  ;;  %v1694_v0 = vld [vmem:[%s5344_s21 + $0x50] sm:$0xff] }
  0x60   : > { %4131 = vmatprep.subr.bf16.mxu1 %v4512_v9  ;;  %4125 = vmatprep.mubr.msk.bf16.mxu0 %vm4513_vm1, %v4512_v9  ;;  %v1721_v2 = vpack.c.bf16 %v1695_v1, %v1694_v0  ;;  %v3855_v0 = vld [vmem:[%s4651_s20 + $0x1] ss:$0 sm:$0xff] }
  0x61   : > { %4133 = vmatprep.mubr.msk.bf16.mxu1 %vm4513_vm1, %v4512_v9 }
  0x62   : > { %4124 = vmatpush3.bf16.msra.mxu0 %v1293_v5  ;;  %v1723_v5 = vpack.c.bf16 %v1699_v4, %v1698_v3 }
  0x63   : > { %4132 = vmatpush3.bf16.msra.mxu1 %v1295_v6  ;;  %4137 = vmatprep.subr.bf16.mxu0 %v4512_v9  ;;  %v1700_v6 = vld [vmem:[%s5344_s21 + $0x80] sm:$0xff] }
  0x64   : > { %4145 = vmatprep.subr.bf16.mxu1 %v4512_v9  ;;  %v1724_v8 = vpack.c.bf16 %v1701_v7, %v1700_v6 }
  0x65   : > { %4126 = vmatmul.mubr.msk.bf16.vlgmr.msra.gmra.mrb[16].mxu0 %vm933_vm2, %v4736_v24 }
  0x66   : > { %4134 = vmatmul.mubr.msk.bf16.vlgmr.msra.gmra.mrb[16].mxu1 %vm933_vm2, %v4736_v24  ;;  %4138 = vmatpush3.bf16.msra.mxu0 %v1296_v12  ;;  %v1726_v12 = vpack.c.bf16 %v1705_v11, %v1704_v10 }
  0x67   : > { %4146 = vmatpush3.bf16.msra.mxu1 %v1298_v13  ;;  %4139 = vmatprep.subr.bf16.mxu0 %v4512_v9  ;;  %v1702_v13 = vld [vmem:[%s5344_s21 + $0x90] sm:$0xff] }
  0x68   : > { %4147 = vmatprep.subr.bf16.mxu1 %v4512_v9  ;;  %4141 = vmatprep.mubr.msk.bf16.mxu0 %vm4513_vm1, %v4512_v9  ;;  %v1725_v15 = vpack.c.bf16 %v1703_v14, %v1702_v13 }
  0x69   : > { %4149 = vmatprep.mubr.msk.bf16.mxu1 %vm4513_vm1, %v4512_v9 }
  0x6a   : > { %4140 = vmatpush3.bf16.msra.mxu0 %v1297_v18  ;;  %v1727_v18 = vpack.c.bf16 %v1707_v17, %v1706_v16 }
  0x6b   : > { %4148 = vmatpush3.bf16.msra.mxu1 %v1299_v19  ;;  %4153 = vmatprep.subr.bf16.mxu0 %v4512_v9  ;;  %v1709_v19 = vld [vmem:[%s5344_s21 + $0xc8] sm:$0xff] }
  0x6c   : > { %4161 = vmatprep.subr.bf16.mxu1 %v4512_v9 }
  0x6d   : > { %4142 = vmatmul.mubr.msk.bf16.vlgmr.msra.gmra.mrb[20].mxu0 %vm933_vm2, %v4736_v24 }
  0x6e   : > { %4150 = vmatmul.mubr.msk.bf16.vlgmr.msra.gmra.mrb[20].mxu1 %vm933_vm2, %v4736_v24  ;;  %4154 = vmatpush3.bf16.msra.mxu0 %v1300_v25  ;;  %v1710_v25 = vld [vmem:[%s5344_s21 + $0xd0] sm:$0xff] }
  0x6f   : > { %4162 = vmatpush3.bf16.msra.mxu1 %v1302_v26  ;;  %4155 = vmatprep.subr.bf16.mxu0 %v4512_v9  ;;  %v1711_v26 = vld [vmem:[%s5344_s21 + $0xd8] sm:$0xff] }
  0x70   : > { %4163 = vmatprep.subr.bf16.mxu1 %v4512_v9  ;;  %4157 = vmatprep.mubr.msk.bf16.mxu0 %vm4513_vm1, %v4512_v9  ;;  %v1729_v27 = vpack.c.bf16 %v1711_v26, %v1710_v25 }
  0x71   : > { %4165 = vmatprep.mubr.msk.bf16.mxu1 %vm4513_vm1, %v4512_v9 }
  0x72   : > { %4156 = vmatpush3.bf16.msra.mxu0 %v1301_v31 }
  0x73   : > { %4164 = vmatpush3.bf16.msra.mxu1 %v1303_v32  ;;  %4169 = vmatprep.subr.bf16.mxu0 %v4512_v9 }
  0x74   : > { %4177 = vmatprep.subr.bf16.mxu1 %v4512_v9 }
  0x75   : > { %4158 = vmatmul.mubr.msk.bf16.vlgmr.msra.gmra.mrb[24].mxu0 %vm933_vm2, %v4778_v50 }
  0x76   : > { %4166 = vmatmul.mubr.msk.bf16.vlgmr.msra.gmra.mrb[24].mxu1 %vm933_vm2, %v4778_v50  ;;  %4170 = vmatpush3.bf16.msra.mxu0 %v1304_v37 }
  0x77   : > { %4178 = vmatpush3.bf16.msra.mxu1 %v1306_v38  ;;  %4171 = vmatprep.subr.bf16.mxu0 %v4512_v9 }
  0x78   : > { %4179 = vmatprep.subr.bf16.mxu1 %v4512_v9  ;;  %4173 = vmatprep.mubr.msk.bf16.mxu0 %vm4513_vm1, %v4512_v9 }
  0x79   : > { %4181 = vmatprep.mubr.msk.bf16.mxu1 %vm4513_vm1, %v4512_v9 }
  0x7a   : > { %4172 = vmatpush3.bf16.msra.mxu0 %v1305_v43 }
  0x7b   : > { %4180 = vmatpush3.bf16.msra.mxu1 %v1307_v44  ;;  %4185 = vmatprep.subr.bf16.mxu0 %v4512_v9 }
  0x7c   : > { %4193 = vmatprep.subr.bf16.mxu1 %v4512_v9 }
  0x7d   : > { %4174 = vmatmul.mubr.msk.bf16.vlgmr.msra.gmra.mrb[28].mxu0 %vm933_vm2, %v4778_v50 }
  0x7e   : > { %4182 = vmatmul.mubr.msk.bf16.vlgmr.msra.gmra.mrb[28].mxu1 %vm933_vm2, %v4778_v50  ;;  %4186 = vmatpush3.bf16.msra.mxu0 %v1716_v47 }
  0x7f   : > { %4187 = vmatprep.subr.bf16.mxu0 %v4512_v9  ;;  %4189 = vmatprep.mubr.msk.bf16.mxu0 %vm4513_vm1, %v4512_v9 }
  0x80   : > { %4197 = vmatprep.mubr.msk.bf16.mxu1 %vm4513_vm1, %v4512_v9  ;;  %4194 = vmatpush3.bf16.msra.mxu1 %v1718_v51 }
  0x81   : > { %4195 = vmatprep.subr.bf16.mxu1 %v4512_v9 }
  0x82   : > { %4188 = vmatpush3.bf16.msra.mxu0 %v1717_v54 }
  0x83   : > { %4201 = vmatprep.subr.bf16.mxu0 %v4512_v9 }
  0x84   : > { %4196 = vmatpush3.bf16.msra.mxu1 %v1719_v57 }
  0x85   : > { %4190 = vmatmul.mubr.msk.bf16.vlgmr.msra.gmra.mrb[32].mxu0 %vm933_vm2, %v4736_v24  ;;  %4209 = vmatprep.subr.bf16.mxu1 %v4512_v9 }
  0x86   : > { %4202 = vmatpush3.bf16.msra.mxu0 %v1720_v60  ;;  %4205 = vmatprep.mubr.msk.bf16.mxu0 %vm4513_vm1, %v4512_v9 }
  0x87   : > { %4198 = vmatmul.mubr.msk.bf16.vlgmr.msra.gmra.mrb[32].mxu1 %vm933_vm2, %v4736_v24  ;;  %4203 = vmatprep.subr.bf16.mxu0 %v4512_v9 }
  0x88   : > { %4210 = vmatpush3.bf16.msra.mxu1 %v1722_v63  ;;  %4213 = vmatprep.mubr.msk.bf16.mxu1 %vm4513_vm1, %v4512_v9  ;;  %v3854_v63 = vld [vmem:[%s4651_s20] ss:$0 sm:$0xff] }
  0x89   : > { %4211 = vmatprep.subr.bf16.mxu1 %v4512_v9 }
  0x8a   : > { %4204 = vmatpush3.bf16.msra.mxu0 %v1721_v2 }
  0x8b   : > { %4217 = vmatprep.subr.bf16.mxu0 %v4512_v9 }
  0x8c   : > { %4212 = vmatpush3.bf16.msra.mxu1 %v1723_v5 }
  0x8d   : > { %4206 = vmatmul.mubr.msk.bf16.vlgmr.msra.gmra.mrb[36].mxu0 %vm933_vm2, %v4736_v24  ;;  %4225 = vmatprep.subr.bf16.mxu1 %v4512_v9 }
  0x8e   : > { %4218 = vmatpush3.bf16.msra.mxu0 %v1724_v8  ;;  %4221 = vmatprep.mubr.msk.bf16.mxu0 %vm4513_vm1, %v4512_v9 }
  0x8f   : > { %4214 = vmatmul.mubr.msk.bf16.vlgmr.msra.gmra.mrb[36].mxu1 %vm933_vm2, %v4736_v24  ;;  %4219 = vmatprep.subr.bf16.mxu0 %v4512_v9  ;;  %v1708_v24 = vld [vmem:[%s5344_s21 + $0xc0] sm:$0xff] }
  0x90   : > { %4226 = vmatpush3.bf16.msra.mxu1 %v1726_v12  ;;  %4229 = vmatprep.mubr.msk.bf16.mxu1 %vm4513_vm1, %v4512_v9  ;;  %v1728_v21 = vpack.c.bf16 %v1709_v19, %v1708_v24  ;;  %v3838_v12 = vld [vmem:[%s4646_s28] ss:$0 sm:$0xff]  ;;  %v3857_v19 = vld [vmem:[%s4651_s20 + $0x3] ss:$0 sm:$0xff] }
  0x91   : > { %4227 = vmatprep.subr.bf16.mxu1 %v4512_v9 }
  0x92   : > { %4220 = vmatpush3.bf16.msra.mxu0 %v1725_v15  ;;  %v3839_v15 = vld [vmem:[%s4646_s28 + $0x1] ss:$0 sm:$0xff] }
  0x93   : > { %4233 = vmatprep.subr.bf16.mxu0 %v4512_v9 }
  0x94   : > { %4228 = vmatpush3.bf16.msra.mxu1 %v1727_v18  ;;  %v3856_v18 = vld [vmem:[%s4651_s20 + $0x2] ss:$0 sm:$0xff] }
  0x95   : > { %4222 = vmatmul.mubr.msk.bf16.vlgmr.msra.gmra.mrb[40].mxu0 %vm933_vm2, %v4778_v50  ;;  %4241 = vmatprep.subr.bf16.mxu1 %v4512_v9 }
  0x96   : > { %4237 = vmatprep.mubr.msk.bf16.mxu0 %vm4513_vm1, %v4512_v9  ;;  %4234 = vmatpush3.bf16.msra.mxu0 %v1728_v21 }
  0x97   : > { %4230 = vmatmul.mubr.msk.bf16.vlgmr.msra.gmra.mrb[40].mxu1 %vm933_vm2, %v4778_v50  ;;  %4235 = vmatprep.subr.bf16.mxu0 %v4512_v9 }
  0x98   : > { %4245 = vmatprep.mubr.msk.bf16.mxu1 %vm4513_vm1, %v4512_v9  ;;  %4242 = vmatpush3.bf16.msra.mxu1 %v1730_v23 }
  0x99   : > { %4243 = vmatprep.subr.bf16.mxu1 %v4512_v9 }
  0x9a   : > { %4236 = vmatpush3.bf16.msra.mxu0 %v1729_v27 }
  0x9b   : > { %4249 = vmatprep.subr.bf16.mxu0 %v4512_v9 }
  0x9c   : > { %4244 = vmatpush3.bf16.msra.mxu1 %v1731_v30 }
  0x9d   : > { %4255 = vmatprep.subr.bf16.mxu1 %v4512_v9  ;;  %4238 = vmatmul.mubr.msk.bf16.vlgmr.msra.gmra.mrb[44].mxu0 %vm933_vm2, %v4778_v50 }
  0x9e   : > { %4251 = vmatprep.mubr.msk.bf16.mxu0 %vm4513_vm1, %v4512_v9 }
  0x9f   : > { %4246 = vmatmul.mubr.msk.bf16.vlgmr.msra.gmra.mrb[44].mxu1 %vm933_vm2, %v4778_v50 }
  0xa0   : > { %4257 = vmatprep.mubr.msk.bf16.mxu1 %vm4513_vm1, %v4512_v9 }
 0x118   : > { %v971_v31 = vpop.f32.mrb[0].mxu0 }
 0x119   : > { %v4063_v32 = vpop.f32.mrb[1].mxu0  ;;  %v1011_v33 = vpop.f32.mrb[0].mxu1  ;;  %v972_v24 = vadd.f32 %v3838_v12, %v971_v31 }
 0x11a   : > { %v974_v34 = vpop.f32.mrb[2].mxu0  ;;  %v4071_v35 = vpop.f32.mrb[1].mxu1  ;;  %v1012_v20 = vadd.f32 %v3839_v15, %v1011_v33 }
 0x11b   : > { %v4064_v36 = vpop.f32.mrb[3].mxu0  ;;  %v1014_v37 = vpop.f32.mrb[2].mxu1  ;;  %v2108_v29 = vpack.c.bf16 %v972_v24, %v972_v24  ;;  %v3840_v35 = vld [vmem:[%s4646_s28 + $0x2] ss:$0 sm:$0xff] }
 0x11c   : > { %v4072_v38 = vpop.f32.mrb[3].mxu1  ;;  %v2109_v34 = vpack.c.bf16 %v1012_v20, %v1012_v20  ;;  %v3841_v37 = vld [vmem:[%s4646_s28 + $0x3] ss:$0 sm:$0xff] }
 0x120   : > { %v4966_v39 = vpop.f32.mrb[4].mxu0 }
 0x121   : > { %v4079_v40 = vpop.f32.mrb[5].mxu0  ;;  %v4968_v41 = vpop.f32.mrb[4].mxu1 }
 0x122   : > { %v1054_v50 = vpop.f32.mrb[6].mxu0  ;;  %v4087_v42 = vpop.f32.mrb[5].mxu1 }
 0x123   : > { %v4080_v43 = vpop.f32.mrb[7].mxu0  ;;  %v1094_v44 = vpop.f32.mrb[6].mxu1  ;;  %v3858_v50 = vld [vmem:[%s4651_s20 + $0x4] ss:$0 sm:$0xff]  ;;  %v1052_v42 = vadd.f32 %v3840_v35, %v4966_v39 }
 0x124   : > { %v4088_v45 = vpop.f32.mrb[7].mxu1  ;;  %v3859_v43 = vld [vmem:[%s4651_s20 + $0x5] ss:$0 sm:$0xff]  ;;  %v1092_v44 = vadd.f32 %v3841_v37, %v4968_v41 }
 0x128   : > { %v4970_v46 = vpop.f32.mrb[8].mxu0 }
 0x129   : > { %v4095_v47 = vpop.f32.mrb[9].mxu0  ;;  %v4972_v48 = vpop.f32.mrb[8].mxu1 }
 0x12a   : > { %v1137_v49 = vpop.f32.mrb[10].mxu0  ;;  %v4103_v51 = vpop.f32.mrb[9].mxu1 }
 0x12b   : > { %v4096_v52 = vpop.f32.mrb[11].mxu0  ;;  %v1177_v53 = vpop.f32.mrb[10].mxu1 }
 0x12c   : > { %v4104_v54 = vpop.f32.mrb[11].mxu1 }
 0x12d   : > { %v2110_v54 = vpack.c.bf16 %v1052_v42, %v1052_v42 }
 0x130   : > { %v4974_v55 = vpop.f32.mrb[12].mxu0 }
 0x131   : > { %v4111_v56 = vpop.f32.mrb[13].mxu0  ;;  %v4976_v57 = vpop.f32.mrb[12].mxu1 }
 0x132   : > { %v1217_v58 = vpop.f32.mrb[14].mxu0  ;;  %v4119_v59 = vpop.f32.mrb[13].mxu1 }
 0x133   : > { %v4112_v60 = vpop.f32.mrb[15].mxu0  ;;  %v1257_v61 = vpop.f32.mrb[14].mxu1  ;;  %v2111_v59 = vpack.c.bf16 %v1092_v44, %v1092_v44 }
 0x134   : > { %v4120_v62 = vpop.f32.mrb[15].mxu1  ;;  %v3842_v60 = vld [vmem:[%s4646_s28 + $0x4] ss:$0 sm:$0xff] }
 0x138   : > { %v1398_v1 = vpop.f32.mrb[16].mxu0 }
 0x139   : > { %v1399_v2 = vadd.f32 %v3854_v63, %v1398_v1  ;;  %v1438_v3 = vpop.f32.mrb[16].mxu1  ;;  %v4127_v4 = vpop.f32.mrb[17].mxu0  ;;  %v3843_v63 = vld [vmem:[%s4646_s28 + $0x5] ss:$0 sm:$0xff] }
 0x13a   : > { %v1439_v5 = vadd.f32 %v3855_v0, %v1438_v3  ;;  %v1401_v6 = vpop.f32.mrb[18].mxu0  ;;  %v4135_v7 = vpop.f32.mrb[17].mxu1  ;;  %v1135_v3 = vadd.f32 %v3842_v60, %v4970_v46  ;;  %v3861_v4 = vld [vmem:[%s4651_s20 + $0x7] ss:$0 sm:$0xff] }
 0x13b   : > { %v2116_v8 = vpack.c.bf16 %v1399_v2, %v1399_v2  ;;  %v4128_v10 = vpop.f32.mrb[19].mxu0  ;;  %v1441_v11 = vpop.f32.mrb[18].mxu1  ;;  %v3860_v2 = vld [vmem:[%s4651_s20 + $0x6] ss:$0 sm:$0xff]  ;;  %s5345_s20 = sld [smem:[#allocation10_spill]] }
 0x13c   : > { %v2117_v13 = vpack.c.bf16 %v1439_v5, %v1439_v5  ;;  %v4136_v14 = vpop.f32.mrb[19].mxu1  ;;  %v1175_v5 = vadd.f32 %v3843_v63, %v4972_v48 }
 0x13d   : > { %v2129_v16 = vsel %vm2124_vm3, %v2116_v8, 0 }
 0x13e   : > { %v2175_v17 = vsel %vm2124_vm3, %v2117_v13, 0  ;;  %4250 = vmatpush3.bf16.xpose.msra.mxu0 %v2129_v16  ;;  %v2112_v13 = vpack.c.bf16 %v1135_v3, %v1135_v3  ;;  %v2113_v16 = vpack.c.bf16 %v1175_v5, %v1175_v5 }
 0x13f   : > { %4256 = vmatpush3.bf16.xpose.msra.mxu1 %v2175_v17  ;;  %4261 = vmatprep.subr.bf16.mxu0 %v4512_v9  ;;  %v3844_v17 = vld [vmem:[%s4646_s28 + $0x6] ss:$0 sm:$0xff] }
 0x140   : > { %v1478_v21 = vpop.f32.mrb[20].mxu0  ;;  %4267 = vmatprep.subr.bf16.mxu1 %v4512_v9 }
 0x141   : > { %v1479_v22 = vadd.f32 %v3856_v18, %v1478_v21  ;;  %v1518_v23 = vpop.f32.mrb[20].mxu1  ;;  %v4143_v25 = vpop.f32.mrb[21].mxu0 }
 0x142   : > { %v1519_v26 = vadd.f32 %v3857_v19, %v1518_v23  ;;  %v1481_v27 = vpop.f32.mrb[22].mxu0  ;;  %v4151_v28 = vpop.f32.mrb[21].mxu1  ;;  %v3845_v19 = vld [vmem:[%s4646_s28 + $0x7] ss:$0 sm:$0xff] }
 0x143   : > { %v2118_v30 = vpack.c.bf16 %v1479_v22, %v1479_v22  ;;  %v4144_v31 = vpop.f32.mrb[23].mxu0  ;;  %v1521_v32 = vpop.f32.mrb[22].mxu1  ;;  %v1215_v22 = vadd.f32 %v3844_v17, %v4974_v55  ;;  %v1255_v23 = vadd.f32 %v3845_v19, %v4976_v57  ;;  %v3870_v55 = vld [vmem:[%s5345_s20] ss:$0 sm:$0xff]  ;;  %v3871_v27 = vld [vmem:[%s5345_s20 + $0x1] ss:$0 sm:$0xff] }
 0x144   : > { %v2119_v36 = vpack.c.bf16 %v1519_v26, %v1519_v26  ;;  %v4152_v33 = vpop.f32.mrb[23].mxu1 }
 0x145   : > { %v2221_v38 = vsel %vm2124_vm3, %v2118_v30, 0  ;;  %4252 = vmatmul.mubr.msk.bf16.vlgmr.msra.gmra.mrb[48].mxu0 %vm2124_vm3, %v2108_v29  ;;  %v2114_v25 = vpack.c.bf16 %v1215_v22, %v1215_v22  ;;  %v2115_v26 = vpack.c.bf16 %v1255_v23, %v1255_v23 }
 0x146   : > { %v2267_v40 = vsel %vm2124_vm3, %v2119_v36, 0  ;;  %4258 = vmatmul.mubr.msk.bf16.vlgmr.msra.gmra.mrb[48].mxu1 %vm2124_vm3, %v2109_v34  ;;  %4262 = vmatpush3.bf16.xpose.msra.mxu0 %v2221_v38 }
 0x147   : > { %4268 = vmatpush3.bf16.xpose.msra.mxu1 %v2267_v40  ;;  %4263 = vmatprep.mubr.msk.bf16.mxu0 %vm4513_vm1, %v4512_v9 }
 0x148   : > { %v1558_v45 = vpop.f32.mrb[24].mxu0  ;;  %4269 = vmatprep.mubr.msk.bf16.mxu1 %vm4513_vm1, %v4512_v9  ;;  %4273 = vmatprep.subr.bf16.mxu0 %v4512_v9 }
 0x149   : > { %v1559_v47 = vadd.f32 %v3858_v50, %v1558_v45  ;;  %v1598_v49 = vpop.f32.mrb[24].mxu1  ;;  %v4159_v51 = vpop.f32.mrb[25].mxu0  ;;  %4279 = vmatprep.subr.bf16.mxu1 %v4512_v9 }
 0x14a   : > { %v1599_v39 = vadd.f32 %v3859_v43, %v1598_v49  ;;  %v1561_v52 = vpop.f32.mrb[26].mxu0  ;;  %v4167_v53 = vpop.f32.mrb[25].mxu1 }
 0x14b   : > { %v2120_v56 = vpack.c.bf16 %v1559_v47, %v1559_v47  ;;  %v4160_v41 = vpop.f32.mrb[27].mxu0  ;;  %v1601_v58 = vpop.f32.mrb[26].mxu1 }
 0x14c   : > { %v2121_v61 = vpack.c.bf16 %v1599_v39, %v1599_v39  ;;  %v4168_v62 = vpop.f32.mrb[27].mxu1 }
 0x14d   : > { %v2313_v0 = vsel %vm2124_vm3, %v2120_v56, 0  ;;  %4264 = vmatmul.mubr.msk.bf16.vlgmr.msra.gmra.mrb[52].mxu0 %vm2124_vm3, %v2110_v54 }
 0x14e   : > { %v2359_v1 = vsel %vm2124_vm3, %v2121_v61, 0  ;;  %4270 = vmatmul.mubr.msk.bf16.vlgmr.msra.gmra.mrb[52].mxu1 %vm2124_vm3, %v2111_v59  ;;  %4274 = vmatpush3.bf16.xpose.msra.mxu0 %v2313_v0 }
 0x14f   : > { %4280 = vmatpush3.bf16.xpose.msra.mxu1 %v2359_v1  ;;  %4275 = vmatprep.mubr.msk.bf16.mxu0 %vm4513_vm1, %v4512_v9 }
 0x150   : > { %v1638_v6 = vpop.f32.mrb[28].mxu0  ;;  %4281 = vmatprep.mubr.msk.bf16.mxu1 %vm4513_vm1, %v4512_v9  ;;  %4285 = vmatprep.subr.bf16.mxu0 %v4512_v9 }
 0x151   : > { %v1639_v7 = vadd.f32 %v3860_v2, %v1638_v6  ;;  %v1678_v8 = vpop.f32.mrb[28].mxu1  ;;  %v4175_v10 = vpop.f32.mrb[29].mxu0  ;;  %4291 = vmatprep.subr.bf16.mxu1 %v4512_v9 }
 0x152   : > { %v1679_v46 = vadd.f32 %v3861_v4, %v1678_v8  ;;  %v1641_v11 = vpop.f32.mrb[30].mxu0  ;;  %v4183_v12 = vpop.f32.mrb[29].mxu1 }
 0x153   : > { %v2122_v14 = vpack.c.bf16 %v1639_v7, %v1639_v7  ;;  %v4176_v15 = vpop.f32.mrb[31].mxu0  ;;  %v1681_v48 = vpop.f32.mrb[30].mxu1 }
 0x154   : > { %v2123_v18 = vpack.c.bf16 %v1679_v46, %v1679_v46  ;;  %v4184_v24 = vpop.f32.mrb[31].mxu1 }
 0x155   : > { %v2405_v20 = vsel %vm2124_vm3, %v2122_v14, 0  ;;  %4276 = vmatmul.mubr.msk.bf16.vlgmr.msra.gmra.mrb[56].mxu0 %vm2124_vm3, %v2112_v13 }
 0x156   : > { %v2451_v21 = vsel %vm2124_vm3, %v2123_v18, 0  ;;  %4282 = vmatmul.mubr.msk.bf16.vlgmr.msra.gmra.mrb[56].mxu1 %vm2124_vm3, %v2113_v16  ;;  %4286 = vmatpush3.bf16.xpose.msra.mxu0 %v2405_v20 }
 0x157   : > { %4292 = vmatpush3.bf16.xpose.msra.mxu1 %v2451_v21  ;;  %4287 = vmatprep.mubr.msk.bf16.mxu0 %vm4513_vm1, %v4512_v9 }
 0x158   : > { %4293 = vmatprep.mubr.msk.bf16.mxu1 %vm4513_vm1, %v4512_v9  ;;  %4297 = vmatprep.subr.bf16.mxu0 %v4512_v9  ;;  %v1822_v57 = vpop.f32.mrb[32].mxu0 }
 0x159   : > { %4303 = vmatprep.subr.bf16.mxu1 %v4512_v9  ;;  %v1823_v28 = vadd.f32 %v3870_v55, %v1822_v57  ;;  %v4191_v29 = vpop.f32.mrb[33].mxu0 }
 0x15a   : > { %v1825_v30 = vpop.f32.mrb[34].mxu0  ;;  %v1862_v31 = vpop.f32.mrb[32].mxu1 }
 0x15b   : > { %v2597_v32 = vpack.c.bf16 %v1823_v28, %v1823_v28  ;;  %v4192_v34 = vpop.f32.mrb[35].mxu0  ;;  %v1863_v35 = vadd.f32 %v3871_v27, %v1862_v31  ;;  %v4199_v36 = vpop.f32.mrb[33].mxu1 }
 0x15c   : > { %v1865_v33 = vpop.f32.mrb[34].mxu1 }
 0x15d   : > { %4288 = vmatmul.mubr.msk.bf16.vlgmr.msra.gmra.mrb[60].mxu0 %vm2124_vm3, %v2114_v25  ;;  %v2610_v37 = vsel %vm2608_vm4, %v2597_v32, 0  ;;  %v2598_v38 = vpack.c.bf16 %v1863_v35, %v1863_v35  ;;  %v4200_v40 = vpop.f32.mrb[35].mxu1 }
 0x15e   : > { %4294 = vmatmul.mubr.msk.bf16.vlgmr.msra.gmra.mrb[60].mxu1 %vm2124_vm3, %v2115_v26  ;;  %4299 = vmatprep.mubr.msk.bf16.mxu0 %vm4513_vm1, %v4512_v9 }
 0x15f   : > { %4305 = vmatprep.mubr.msk.bf16.mxu1 %vm4513_vm1, %v4512_v9  ;;  %4298 = vmatpush3.bf16.msra.mxu0 %v2610_v37  ;;  %v2656_v50 = vsel %vm2608_vm4, %v2598_v38, 0 }
 0x160   : > { %4309 = vmatprep.subr.bf16.mxu0 %v4512_v9  ;;  %v5045_v42 = vpop.f32.mrb[36].mxu0  ;;  %4304 = vmatpush3.bf16.msra.mxu1 %v2656_v50 }
 0x161   : > { %v4207_v43 = vpop.f32.mrb[37].mxu0  ;;  %4315 = vmatprep.subr.bf16.mxu1 %v4512_v9 }
 0x162   : > { %v1905_v44 = vpop.f32.mrb[38].mxu0  ;;  %v5048_v45 = vpop.f32.mrb[36].mxu1 }
 0x163   : > { %v4208_v47 = vpop.f32.mrb[39].mxu0  ;;  %v4215_v49 = vpop.f32.mrb[37].mxu1 }
 0x164   : > { %v1945_v51 = vpop.f32.mrb[38].mxu1 }
 0x165   : > { %v4216_v39 = vpop.f32.mrb[39].mxu1 }
 0x168   : > { %v5050_v52 = vpop.f32.mrb[40].mxu0 }
 0x169   : > { %v4223_v53 = vpop.f32.mrb[41].mxu0 }
 0x16a   : > { %v1985_v54 = vpop.f32.mrb[42].mxu0  ;;  %v5052_v56 = vpop.f32.mrb[40].mxu1 }
 0x16b   : > { %v4224_v41 = vpop.f32.mrb[43].mxu0  ;;  %v4231_v58 = vpop.f32.mrb[41].mxu1 }
 0x16c   : > { %v2025_v59 = vpop.f32.mrb[42].mxu1 }
 0x16d   : > { %v4232_v60 = vpop.f32.mrb[43].mxu1 }
 0x170   : > { %v5054_v61 = vpop.f32.mrb[44].mxu0 }
 0x171   : > { %v4239_v62 = vpop.f32.mrb[45].mxu0 }
 0x172   : > { %v5056_v63 = vpop.f32.mrb[44].mxu1  ;;  %v2065_v0 = vpop.f32.mrb[46].mxu0 }
 0x173   : > { %v4247_v1 = vpop.f32.mrb[45].mxu1  ;;  %v4240_v2 = vpop.f32.mrb[47].mxu0 }
 0x174   : > { %v2105_v3 = vpop.f32.mrb[46].mxu1 }
 0x175   : > { %v4248_v4 = vpop.f32.mrb[47].mxu1 }
 0x218   : > { %v2165_v5 = vpop.f32.mrb[48].mxu0 }
 0x219   : > { %v2493_v6 = vmul.f32 0.35355338, %v2165_v5  ;;  %v2211_v7 = vpop.f32.mrb[48].mxu1  ;;  %v4253_v8 = vpop.f32.mrb[49].mxu0 }
 0x21a   : > { %v4259_v10 = vpop.f32.mrb[49].mxu1  ;;  %v2168_v46 = vpop.f32.mrb[50].mxu0  ;;  %v2494_v11 = vmul.f32 0.35355338, %v2211_v7 }
 0x21b   : > { %v2214_v12 = vpop.f32.mrb[50].mxu1  ;;  %v4254_v13 = vpop.f32.mrb[51].mxu0  ;;  %v2501_v14 = vsel %vm2124_vm3, %v2493_v6, -inf }
 0x21c   : > { %v4260_v15 = vpop.f32.mrb[51].mxu1  ;;  %2502 = vmax.xlane.f32.xlu0 %v2501_v14  ;;  %v2504_v48 = vsel %vm2124_vm3, %v2494_v11, -inf }
 0x220   : > { %2505 = vmax.xlane.f32.xlu0 %v2504_v48  ;;  %v2257_v16 = vpop.f32.mrb[52].mxu0 }
 0x221   : > { %v2303_v17 = vpop.f32.mrb[52].mxu1  ;;  %v2495_v18 = vmul.f32 0.35355338, %v2257_v16  ;;  %v4265_v24 = vpop.f32.mrb[53].mxu0 }
 0x222   : > { %v4271_v19 = vpop.f32.mrb[53].mxu1  ;;  %v2260_v20 = vpop.f32.mrb[54].mxu0  ;;  %v2496_v21 = vmul.f32 0.35355338, %v2303_v17 }
 0x223   : > { %v2306_v22 = vpop.f32.mrb[54].mxu1  ;;  %v4266_v23 = vpop.f32.mrb[55].mxu0  ;;  %v2507_v25 = vsel %vm2124_vm3, %v2495_v18, -inf }
 0x224   : > { %v4272_v26 = vpop.f32.mrb[55].mxu1  ;;  %2508 = vmax.xlane.f32.xlu1 %v2507_v25  ;;  %v2510_v55 = vsel %vm2124_vm3, %v2496_v21, -inf }
 0x228   : > { %2511 = vmax.xlane.f32.xlu1 %v2510_v55  ;;  %v2349_v57 = vpop.f32.mrb[56].mxu0 }
 0x229   : > { %v2395_v27 = vpop.f32.mrb[56].mxu1  ;;  %v2497_v28 = vmul.f32 0.35355338, %v2349_v57  ;;  %v4277_v29 = vpop.f32.mrb[57].mxu0 }
 0x22a   : > { %v2498_v30 = vmul.f32 0.35355338, %v2395_v27  ;;  %v4283_v31 = vpop.f32.mrb[57].mxu1  ;;  %v2352_v32 = vpop.f32.mrb[58].mxu0 }
 0x22b   : > { %v2398_v34 = vpop.f32.mrb[58].mxu1  ;;  %v4278_v35 = vpop.f32.mrb[59].mxu0  ;;  %v2513_v36 = vsel %vm2124_vm3, %v2497_v28, -inf }
 0x22c   : > { %v4284_v33 = vpop.f32.mrb[59].mxu1  ;;  %v2516_v37 = vsel %vm2124_vm3, %v2498_v30, -inf  ;;  %2514 = vmax.xlane.f32.xlu0 %v2513_v36  ;;  %v3872_v36 = vld [vmem:[%s5345_s20 + $0x2] ss:$0 sm:$0xff] }
 0x22d   : > { %2517 = vmax.xlane.f32.xlu1 %v2516_v37  ;;  %v1903_v33 = vadd.f32 %v3872_v36, %v5045_v42 }
 0x230   : > { %v2441_v38 = vpop.f32.mrb[60].mxu0 }
 0x231   : > { %v2499_v40 = vmul.f32 0.35355338, %v2441_v38  ;;  %v2487_v50 = vpop.f32.mrb[60].mxu1  ;;  %v4289_v43 = vpop.f32.mrb[61].mxu0  ;;  %v3873_v38 = vld [vmem:[%s5345_s20 + $0x3] ss:$0 sm:$0xff] }
 0x232   : > { %v2500_v44 = vmul.f32 0.35355338, %v2487_v50  ;;  %v4295_v47 = vpop.f32.mrb[61].mxu1  ;;  %v2444_v49 = vpop.f32.mrb[62].mxu0  ;;  %v2599_v50 = vpack.c.bf16 %v1903_v33, %v1903_v33  ;;  %v1943_v43 = vadd.f32 %v3873_v38, %v5048_v45 }
 0x233   : > { %v2490_v51 = vpop.f32.mrb[62].mxu1  ;;  %v4290_v39 = vpop.f32.mrb[63].mxu0  ;;  %v2519_v53 = vsel %vm2124_vm3, %v2499_v40, -inf  ;;  %v3874_v49 = vld [vmem:[%s5345_s20 + $0x4] ss:$0 sm:$0xff] }
 0x234   : > { %v4296_v54 = vpop.f32.mrb[63].mxu1  ;;  %v2522_v41 = vsel %vm2124_vm3, %v2500_v44, -inf  ;;  %2520 = vmax.xlane.f32.xlu0 %v2519_v53  ;;  %v2702_v53 = vsel %vm2608_vm4, %v2599_v50, 0 }
 0x235   : > { %2523 = vmax.xlane.f32.xlu1 %v2522_v41  ;;  %v2600_v54 = vpack.c.bf16 %v1943_v43, %v1943_v43  ;;  %v1983_v41 = vadd.f32 %v3874_v49, %v5050_v52  ;;  %v2986_v43 = vld [vmem:[%s4666_s18 + $0x20] sm:$0xff] }
 0x237   : > { %v2601_v52 = vpack.c.bf16 %v1983_v41, %v1983_v41  ;;  %v2987_v41 = vld [vmem:[%s4666_s18 + $0x28] sm:$0xff] }
 0x2a9   : > { %v2503_v58 = vpop.xlane.xlu0 %2502 }
 0x2aa   : > { %v2525_v59 = vsub.f32 %v2493_v6, %v2503_v58 }
 0x2ac   : > { %v2533_v60 = vmul.f32 1.442695, %v2525_v59  ;;  %v3875_v59 = vld [vmem:[%s5345_s20 + $0x5] ss:$0 sm:$0xff] }
 0x2ad   : > { %v2506_v62 = vpop.xlane.xlu0 %2505 }
 0x2ae   : > { %4432 = vpow2.f32 %v2533_v60  ;;  %v2526_v0 = vsub.f32 %v2494_v11, %v2506_v62 }
 0x2b0   : > { %v2535_v1 = vmul.f32 1.442695, %v2526_v0  ;;  %v2748_v0 = vsel %vm2608_vm4, %v2600_v54, 0 }
 0x2b1   : > { %v2509_v2 = vpop.xlane.xlu1 %2508 }
 0x2b2   : > { %4434 = vpow2.f32 %v2535_v1  ;;  %v2527_v3 = vsub.f32 %v2495_v18, %v2509_v2  ;;  %v2023_v1 = vadd.f32 %v3875_v59, %v5052_v56 }
 0x2b4   : > { %v2537_v4 = vmul.f32 1.442695, %v2527_v3  ;;  %v3876_v3 = vld [vmem:[%s5345_s20 + $0x6] ss:$0 sm:$0xff] }
 0x2b5   : > { %v2512_v5 = vpop.xlane.xlu1 %2511 }
 0x2b6   : > { %4436 = vpow2.f32 %v2537_v4  ;;  %v2528_v7 = vsub.f32 %v2496_v21, %v2512_v5 }
 0x2b8   : > { %v4433_v8 = vpop.eup %4432  ;;  %v2539_v10 = vmul.f32 1.442695, %v2528_v7  ;;  %v2794_v7 = vsel %vm2608_vm4, %v2601_v52, 0  ;;  %v2988_v52 = vld [vmem:[%s4666_s18 + $0x30] sm:$0xff] }
 0x2b9   : > { %v2515_v46 = vpop.xlane.xlu0 %2514  ;;  %v2549_v12 = vsel %vm2124_vm3, %v4433_v8, 0.0 }
 0x2ba   : > { %4438 = vpow2.f32 %v2539_v10  ;;  %v2518_v13 = vpop.xlane.xlu1 %2517  ;;  %v2529_v6 = vsub.f32 %v2497_v28, %v2515_v46  ;;  %2550 = vadd.xlane.f32.xlu0 %v2549_v12  ;;  %v2063_v10 = vadd.f32 %v3876_v3, %v5054_v61  ;;  %v3877_v12 = vld [vmem:[%s5345_s20 + $0x7] ss:$0 sm:$0xff] }
 0x2bb   : > { %v2530_v14 = vsub.f32 %v2498_v30, %v2518_v13 }
 0x2bc   : > { %v4435_v15 = vpop.eup %4434  ;;  %v2541_v11 = vmul.f32 1.442695, %v2529_v6 }
 0x2bd   : > { %v2543_v48 = vmul.f32 1.442695, %v2530_v14  ;;  %v2552_v16 = vsel %vm2124_vm3, %v4435_v15, 0.0 }
 0x2be   : > { %4440 = vpow2.f32 %v2541_v11  ;;  %2553 = vadd.xlane.f32.xlu1 %v2552_v16  ;;  %v2603_v11 = vpack.c.bf16 %v2063_v10, %v2063_v10  ;;  %v2989_v10 = vld [vmem:[%s4666_s18 + $0x38] sm:$0xff] }
 0x2bf   : > { %4442 = vpow2.f32 %v2543_v48  ;;  %v2103_v48 = vadd.f32 %v3877_v12, %v5056_v63 }
 0x2c0   : > { %v4437_v17 = vpop.eup %4436 }
 0x2c1   : > { %v2521_v18 = vpop.xlane.xlu0 %2520  ;;  %v2555_v24 = vsel %vm2124_vm3, %v4437_v17, 0.0 }
 0x2c2   : > { %v2524_v19 = vpop.xlane.xlu1 %2523  ;;  %v2531_v20 = vsub.f32 %v2499_v40, %v2521_v18  ;;  %2556 = vadd.xlane.f32.xlu0 %v2555_v24  ;;  %v2982_v24 = vld [vmem:[%s4666_s18] sm:$0xff] }
 0x2c3   : > { %v2532_v21 = vsub.f32 %v2500_v44, %v2524_v19  ;;  %v2886_v19 = vsel %vm2608_vm4, %v2603_v11, 0 }
 0x2c4   : > { %v5069_v22 = vpop.eup %4438  ;;  %v2545_v23 = vmul.f32 1.442695, %v2531_v20  ;;  %v2604_v20 = vpack.c.bf16 %v2103_v48, %v2103_v48 }
 0x2c5   : > { %v2547_v25 = vmul.f32 1.442695, %v2532_v21  ;;  %v2558_v26 = vsel %vm2124_vm3, %v5069_v22, 0.0  ;;  %v2990_v21 = vpack.c.bf16 %v2982_v24, %v2982_v24 }
 0x2c6   : > { %4444 = vpow2.f32 %v2545_v23  ;;  %2559 = vadd.xlane.f32.xlu1 %v2558_v26 }
 0x2c7   : > { %4446 = vpow2.f32 %v2547_v25  ;;  %v2932_v25 = vsel %vm2608_vm4, %v2604_v20, 0 }
 0x2c8   : > { %v5073_v55 = vpop.eup %4440 }
 0x2c9   : > { %v5075_v57 = vpop.eup %4442  ;;  %v2561_v27 = vsel %vm2124_vm3, %v5073_v55, 0.0 }
 0x2ca   : > { %v2564_v28 = vsel %vm2124_vm3, %v5075_v57, 0.0  ;;  %2562 = vadd.xlane.f32.xlu0 %v2561_v27  ;;  %v3002_v27 = vsel %vm2608_vm4, %v2990_v21, 0 }
 0x2cb   : > { %2565 = vadd.xlane.f32.xlu1 %v2564_v28 }
 0x2d0   : > { %v5081_v29 = vpop.eup %4444 }
 0x2d1   : > { %v5083_v30 = vpop.eup %4446  ;;  %v2567_v31 = vsel %vm2124_vm3, %v5081_v29, 0.0 }
 0x2d2   : > { %v2570_v32 = vsel %vm2124_vm3, %v5083_v30, 0.0  ;;  %2568 = vadd.xlane.f32.xlu0 %v2567_v31 }
 0x2d3   : > { %2571 = vadd.xlane.f32.xlu1 %v2570_v32  ;;  %v2984_v32 = vld [vmem:[%s4666_s18 + $0x10] sm:$0xff] }
 0x347   : > { %v2551_v34 = vpop.xlane.xlu0 %2550 }
 0x348   : > { %4448 = vrcp.f32 %v2551_v34  ;;  %v2992_v34 = vpack.c.bf16 %v2984_v32, %v2984_v32 }
 0x34a   : > { %v3094_v38 = vsel %vm2608_vm4, %v2992_v34, 0 }
 0x34b   : > { %v2554_v35 = vpop.xlane.xlu1 %2553 }
 0x34c   : > { %4450 = vrcp.f32 %v2554_v35  ;;  %v2985_v35 = vld [vmem:[%s4666_s18 + $0x18] sm:$0xff] }
 0x34f   : > { %v2557_v37 = vpop.xlane.xlu0 %2556 }
 0x350   : > { %4452 = vrcp.f32 %v2557_v37 }
 0x352   : > { %v4449_v40 = vpop.eup %4448 }
 0x353   : > { %v2581_v44 = vmul.f32 %v4449_v40, %v4433_v8  ;;  %v2560_v47 = vpop.xlane.xlu1 %2559  ;;  %v2602_v8 = vpack.c.bf16 %v2023_v1, %v2023_v1  ;;  %v2993_v40 = vpack.c.bf16 %v2985_v35, %v2985_v35 }
 0x354   : > { %4454 = vrcp.f32 %v2560_v47 }
 0x355   : > { %v2589_v51 = vpack.c.bf16 %v2581_v44, %v2581_v44  ;;  %v2840_v61 = vsel %vm2608_vm4, %v2602_v8, 0 }
 0x356   : > { %v4451_v39 = vpop.eup %4450 }
 0x357   : > { %v2582_v42 = vmul.f32 %v4451_v39, %v4435_v15  ;;  %4300 = vmatmul.mubr.msk.bf16.vlgmr.msra.gmra.mrb[64].mxu0 %vm2124_vm3, %v2589_v51  ;;  %v2563_v58 = vpop.xlane.xlu0 %2562  ;;  %v3140_v39 = vsel %vm2608_vm4, %v2993_v40, 0 }
 0x358   : > { %v2566_v60 = vpop.xlane.xlu1 %2565  ;;  %4310 = vmatpush3.bf16.msra.mxu0 %v2702_v53  ;;  %4456 = vrcp.f32 %v2563_v58  ;;  %4311 = vmatprep.mubr.msk.bf16.mxu0 %vm4513_vm1, %v4512_v9  ;;  %v2994_v53 = vpack.c.bf16 %v2986_v43, %v2986_v43 }
 0x359   : > { %4458 = vrcp.f32 %v2566_v60  ;;  %v2590_v45 = vpack.c.bf16 %v2582_v42, %v2582_v42  ;;  %4321 = vmatprep.subr.bf16.mxu0 %v4512_v9 }
 0x35a   : > { %v4453_v62 = vpop.eup %4452 }
 0x35b   : > { %v2583_v2 = vmul.f32 %v4453_v62, %v4437_v17  ;;  %4306 = vmatmul.mubr.msk.bf16.vlgmr.msra.gmra.mrb[64].mxu1 %vm2124_vm3, %v2590_v45  ;;  %v3186_v45 = vsel %vm2608_vm4, %v2994_v53, 0  ;;  %v2995_v62 = vpack.c.bf16 %v2987_v41, %v2987_v41 }
 0x35c   : > { %4316 = vmatpush3.bf16.msra.mxu1 %v2748_v0  ;;  %4317 = vmatprep.mubr.msk.bf16.mxu1 %vm4513_vm1, %v4512_v9 }
 0x35d   : > { %v2591_v4 = vpack.c.bf16 %v2583_v2, %v2583_v2  ;;  %4327 = vmatprep.subr.bf16.mxu1 %v4512_v9 }
 0x35e   : > { %v4455_v5 = vpop.eup %4454 }
 0x35f   : > { %v2584_v46 = vmul.f32 %v4455_v5, %v5069_v22  ;;  %4312 = vmatmul.mubr.msk.bf16.vlgmr.msra.gmra.mrb[68].mxu0 %vm2124_vm3, %v2591_v4  ;;  %v2569_v56 = vpop.xlane.xlu0 %2568  ;;  %v3232_v5 = vsel %vm2608_vm4, %v2995_v62, 0  ;;  %v4472_v62 = vld [vmem:[#allocation2] sm:$0xff] }
 0x360   : > { %v2572_v13 = vpop.xlane.xlu1 %2571  ;;  %4322 = vmatpush3.bf16.msra.mxu0 %v2794_v7  ;;  %4460 = vrcp.f32 %v2569_v56  ;;  %4323 = vmatprep.mubr.msk.bf16.mxu0 %vm4513_vm1, %v4512_v9  ;;  %v2996_v7 = vpack.c.bf16 %v2988_v52, %v2988_v52 }
 0x361   : > { %4462 = vrcp.f32 %v2572_v13  ;;  %v2592_v6 = vpack.c.bf16 %v2584_v46, %v2584_v46  ;;  %4333 = vmatprep.subr.bf16.mxu0 %v4512_v9 }
 0x362   : > { %v4457_v14 = vpop.eup %4456 }
 0x363   : > { %v4459_v15 = vpop.eup %4458  ;;  %v2585_v16 = vmul.f32 %v4457_v14, %v5073_v55  ;;  %4318 = vmatmul.mubr.msk.bf16.vlgmr.msra.gmra.mrb[68].mxu1 %vm2124_vm3, %v2592_v6  ;;  %v3278_v6 = vsel %vm2608_vm4, %v2996_v7, 0  ;;  %v2997_v14 = vpack.c.bf16 %v2989_v10, %v2989_v10 }
 0x364   : > { %4328 = vmatpush3.bf16.msra.mxu1 %v2840_v61  ;;  %4329 = vmatprep.mubr.msk.bf16.mxu1 %vm4513_vm1, %v4512_v9  ;;  %v2586_v17 = vmul.f32 %v4459_v15, %v5075_v57 }
 0x365   : > { %v2593_v18 = vpack.c.bf16 %v2585_v16, %v2585_v16  ;;  %4339 = vmatprep.subr.bf16.mxu1 %v4512_v9 }
 0x366   : > { %v2594_v63 = vpack.c.bf16 %v2586_v17, %v2586_v17  ;;  %v3324_v17 = vsel %vm2608_vm4, %v2997_v14, 0 }
 0x367   : > { %4324 = vmatmul.mubr.msk.bf16.vlgmr.msra.gmra.mrb[72].mxu0 %vm2124_vm3, %v2593_v18 }
 0x368   : > { %4334 = vmatpush3.bf16.msra.mxu0 %v2886_v19  ;;  %4335 = vmatprep.mubr.msk.bf16.mxu0 %vm4513_vm1, %v4512_v9 }
 0x369   : > { %4345 = vmatprep.subr.bf16.mxu0 %v4512_v9 }
 0x36a   : > { %v4461_v22 = vpop.eup %4460 }
 0x36b   : > { %v4463_v23 = vpop.eup %4462  ;;  %v2587_v26 = vmul.f32 %v4461_v22, %v5081_v29  ;;  %4330 = vmatmul.mubr.msk.bf16.vlgmr.msra.gmra.mrb[72].mxu1 %vm2124_vm3, %v2594_v63  ;;  %v2983_v29 = vld [vmem:[%s4666_s18 + $0x8] sm:$0xff]  ;;  %s4514_s18 = smov [#allocation3]  }
 0x36c   : > { %4340 = vmatpush3.bf16.msra.mxu1 %v2932_v25  ;;  %4341 = vmatprep.mubr.msk.bf16.mxu1 %vm4513_vm1, %v4512_v9  ;;  %v2588_v55 = vmul.f32 %v4463_v23, %v5083_v30  ;;  %v2991_v30 = vpack.c.bf16 %v2983_v29, %v2983_v29 }
 0x36d   : > { %v2595_v57 = vpack.c.bf16 %v2587_v26, %v2587_v26  ;;  %4351 = vmatprep.subr.bf16.mxu1 %v4512_v9 }
 0x36e   : > { %v2596_v28 = vpack.c.bf16 %v2588_v55, %v2588_v55  ;;  %v3048_v31 = vsel %vm2608_vm4, %v2991_v30, 0 }
 0x36f   : > { %4336 = vmatmul.mubr.msk.bf16.vlgmr.msra.gmra.mrb[76].mxu0 %vm2124_vm3, %v2595_v57 }
 0x370   : > { %4346 = vmatpush3.bf16.msra.mxu0 %v3002_v27  ;;  %4347 = vmatprep.mubr.msk.bf16.mxu0 %vm4513_vm1, %v4512_v9 }
 0x371   : > { %4357 = vmatprep.subr.bf16.mxu0 %v4512_v9 }
 0x373   : > { %4342 = vmatmul.mubr.msk.bf16.vlgmr.msra.gmra.mrb[76].mxu1 %vm2124_vm3, %v2596_v28 }
 0x374   : > { %4353 = vmatprep.mubr.msk.bf16.mxu1 %vm4513_vm1, %v4512_v9  ;;  %4352 = vmatpush3.bf16.msra.mxu1 %v3048_v31 }
 0x375   : > { %4363 = vmatprep.subr.bf16.mxu1 %v4512_v9 }
 0x42a   : > { %v2646_v36 = vpop.f32.mrb[64].mxu0 }
 0x42b   : > { %v2974_v33 = vpack.c.bf16 %v2646_v36, %v2646_v36  ;;  %v4301_v37 = vpop.f32.mrb[65].mxu0 }
 0x42c   : > { %v2649_v50 = vpop.f32.mrb[66].mxu0 }
 0x42d   : > { %v4302_v44 = vpop.f32.mrb[67].mxu0  ;;  %4348 = vmatmul.mubr.msk.bf16.vlgmr.msra.gmra.mrb[80].mxu0 %vm2124_vm3, %v2974_v33 }
 0x42e   : > { %v2692_v47 = vpop.f32.mrb[64].mxu1  ;;  %4358 = vmatpush3.bf16.msra.mxu0 %v3094_v38  ;;  %4359 = vmatprep.mubr.msk.bf16.mxu0 %vm4513_vm1, %v4512_v9 }
 0x42f   : > { %v2975_v49 = vpack.c.bf16 %v2692_v47, %v2692_v47  ;;  %v4307_v51 = vpop.f32.mrb[65].mxu1  ;;  %4369 = vmatprep.subr.bf16.mxu0 %v4512_v9 }
 0x430   : > { %v2695_v54 = vpop.f32.mrb[66].mxu1 }
 0x431   : > { %v4308_v42 = vpop.f32.mrb[67].mxu1  ;;  %4354 = vmatmul.mubr.msk.bf16.vlgmr.msra.gmra.mrb[80].mxu1 %vm2124_vm3, %v2975_v49 }
 0x432   : > { %v2738_v58 = vpop.f32.mrb[68].mxu0  ;;  %4364 = vmatpush3.bf16.msra.mxu1 %v3140_v39  ;;  %4365 = vmatprep.mubr.msk.bf16.mxu1 %vm4513_vm1, %v4512_v9  ;;  %v3910_v39 = vld [vmem:[%s5346_s7] ss:$0 sm:$0xff]  ;;  %s3617_s7 = sshll.u32 %s4514_s18, 4  ;;  %s3618_s7 = int_to_ptr.vmem [resolvable:$true] %s3617_s7 }
 0x433   : > { %v2976_v59 = vpack.c.bf16 %v2738_v58, %v2738_v58  ;;  %v4313_v60 = vpop.f32.mrb[69].mxu0  ;;  %4375 = vmatprep.subr.bf16.mxu1 %v4512_v9  ;;  %s4474_s29 = scalar_lea.vmem %s3618_s7, 256  ;;  %p4481_p9 = scmp.lt.s32.totalorder %s3618_s7, %s3618_s7 }
 0x434   : > { %v2741_v0 = vpop.f32.mrb[70].mxu0  ;;  %p4475_p6 = scmp.ne.s32.totalorder %s3618_s7, %s4474_s29  ;;  %p4482_p10 = scmp.lt.s32.totalorder %s4474_s29, %s4474_s29 }
 0x435   : > { %v4314_v1 = vpop.f32.mrb[71].mxu0  ;;  %4360 = vmatmul.mubr.msk.bf16.vlgmr.msra.gmra.mrb[84].mxu0 %vm2124_vm3, %v2976_v59 }
 0x436   : > { %v2784_v2 = vpop.f32.mrb[68].mxu1  ;;  %4370 = vmatpush3.bf16.msra.mxu0 %v3186_v45  ;;  %4371 = vmatprep.mubr.msk.bf16.mxu0 %vm4513_vm1, %v4512_v9  ;;  %p4483_p11 = por %p4482_p10, %p4481_p9 }
 0x437   : > { %v2977_v3 = vpack.c.bf16 %v2784_v2, %v2784_v2  ;;  %v4319_v4 = vpop.f32.mrb[69].mxu1  ;;  %4381 = vmatprep.subr.bf16.mxu0 %v4512_v9 }
 0x438   : > { %v2787_v8 = vpop.f32.mrb[70].mxu1 }
 0x439   : > { %v4320_v46 = vpop.f32.mrb[71].mxu1  ;;  %4366 = vmatmul.mubr.msk.bf16.vlgmr.msra.gmra.mrb[84].mxu1 %vm2124_vm3, %v2977_v3 }
 0x43a   : > { %v2830_v56 = vpop.f32.mrb[72].mxu0  ;;  %4376 = vmatpush3.bf16.msra.mxu1 %v3232_v5  ;;  %4377 = vmatprep.mubr.msk.bf16.mxu1 %vm4513_vm1, %v4512_v9 }
 0x43b   : > { %v2978_v12 = vpack.c.bf16 %v2830_v56, %v2830_v56  ;;  %v4325_v13 = vpop.f32.mrb[73].mxu0  ;;  %4387 = vmatprep.subr.bf16.mxu1 %v4512_v9 }
 0x43c   : > { %v2833_v15 = vpop.f32.mrb[74].mxu0 }
 0x43d   : > { %v4326_v61 = vpop.f32.mrb[75].mxu0  ;;  %4372 = vmatmul.mubr.msk.bf16.vlgmr.msra.gmra.mrb[88].mxu0 %vm2124_vm3, %v2978_v12 }
 0x43e   : > { %v2876_v11 = vpop.f32.mrb[72].mxu1  ;;  %4382 = vmatpush3.bf16.msra.mxu0 %v3278_v6  ;;  %4383 = vmatprep.mubr.msk.bf16.mxu0 %vm4513_vm1, %v4512_v9 }
 0x43f   : > { %v2979_v48 = vpack.c.bf16 %v2876_v11, %v2876_v11  ;;  %v4331_v16 = vpop.f32.mrb[73].mxu1  ;;  %4393 = vmatprep.subr.bf16.mxu0 %v4512_v9 }
 0x440   : > { %v2879_v18 = vpop.f32.mrb[74].mxu1 }
 0x441   : > { %v4332_v24 = vpop.f32.mrb[75].mxu1  ;;  %4378 = vmatmul.mubr.msk.bf16.vlgmr.msra.gmra.mrb[88].mxu1 %vm2124_vm3, %v2979_v48 }
 0x442   : > { %v2922_v19 = vpop.f32.mrb[76].mxu0  ;;  %4388 = vmatpush3.bf16.msra.mxu1 %v3324_v17  ;;  %4389 = vmatprep.mubr.msk.bf16.mxu1 %vm4513_vm1, %v4512_v9  ;;  %v4473_v24 = vld [vmem:[#allocation2 + $0x8] sm:$0xff] }
 0x443   : > { %v2980_v20 = vpack.c.bf16 %v2922_v19, %v2922_v19  ;;  %v4337_v63 = vpop.f32.mrb[77].mxu0  ;;  %4401 = vmatprep.subr.bf16.mxu1 %v4512_v9 }
 0x444   : > { %v2925_v21 = vpop.f32.mrb[78].mxu0 }
 0x445   : > { %v4338_v22 = vpop.f32.mrb[79].mxu0  ;;  %4384 = vmatmul.mubr.msk.bf16.vlgmr.msra.gmra.mrb[92].mxu0 %vm2124_vm3, %v2980_v20 }
 0x446   : > { %v2968_v23 = vpop.f32.mrb[76].mxu1  ;;  %4397 = vmatprep.mubr.msk.bf16.mxu0 %vm4513_vm1, %v4512_v9 }
 0x447   : > { %v2981_v25 = vpack.c.bf16 %v2968_v23, %v2968_v23  ;;  %v4343_v26 = vpop.f32.mrb[77].mxu1 }
 0x448   : > { %v2971_v55 = vpop.f32.mrb[78].mxu1 }
 0x449   : > { %v4344_v57 = vpop.f32.mrb[79].mxu1  ;;  %4390 = vmatmul.mubr.msk.bf16.vlgmr.msra.gmra.mrb[92].mxu1 %vm2124_vm3, %v2981_v25 }
 0x44a   : > { %4409 = vmatprep.mubr.msk.bf16.mxu1 %vm4513_vm1, %v4512_v9 }
 0x500   : > { %v3038_v27 = vpop.f32.mrb[80].mxu0 }
 0x501   : > { %v4349_v28 = vpop.f32.mrb[81].mxu0  ;;  %v3366_v32 = vsel %vm933_vm2, %v3038_v27, 0.0 }
 0x502   : > { %v3041_v29 = vpop.f32.mrb[82].mxu0 }
 0x503   : > { %v4350_v30 = vpop.f32.mrb[83].mxu0  ;;  %v3437_v29 = vld [vmem:[%s4680_s3] sm:$0xff] }
 0x504   : > { %v3084_v31 = vpop.f32.mrb[80].mxu1  ;;  %v3438_v30 = vld [vmem:[%s4680_s3 + $0x8] sm:$0xff] }
 0x505   : > { %v3367_v34 = vsel %vm933_vm2, %v3084_v31, 0.0  ;;  %v4355_v35 = vpop.f32.mrb[81].mxu1  ;;  %v3441_v31 = vpack.c.bf16 %v3438_v30, %v3437_v29 }
 0x506   : > { %v3368_v36 = vadd.f32 %v3367_v34, %v3366_v32  ;;  %v3087_v33 = vpop.f32.mrb[82].mxu1  ;;  %v3439_v32 = vld [vmem:[%s4680_s3 + $0x10] sm:$0xff]  ;;  %v3440_v34 = vld [vmem:[%s4680_s3 + $0x18] sm:$0xff] }
 0x507   : > { %v4356_v37 = vpop.f32.mrb[83].mxu1  ;;  %4394 = vmatpush3.bf16.msra.mxu0 %v3441_v31  ;;  %v3442_v35 = vpack.c.bf16 %v3440_v34, %v3439_v32  ;;  %v3498_v33 = vld [vmem:[%s4689_s8 + $0x8] sm:$0xff] }
 0x508   : > { %v3130_v38 = vpop.f32.mrb[84].mxu0  ;;  %4395 = vmatprep.subr.bf16.mxu0 %v4512_v9  ;;  %v3499_v37 = vld [vmem:[%s4689_s8 + $0x10] sm:$0xff] }
 0x509   : > { %v3369_v40 = vsel %vm933_vm2, %v3130_v38, 0.0  ;;  %v4361_v50 = vpop.f32.mrb[85].mxu0 }
 0x50a   : > { %v3370_v43 = vadd.f32 %v3369_v40, %v3368_v36  ;;  %v3133_v44 = vpop.f32.mrb[86].mxu0  ;;  %v3497_v36 = vld [vmem:[%s4689_s8] sm:$0xff]  ;;  %v3500_v40 = vld [vmem:[%s4689_s8 + $0x18] sm:$0xff] }
 0x50b   : > { %v4362_v47 = vpop.f32.mrb[87].mxu0  ;;  %4396 = vmatpush3.bf16.msra.mxu0 %v3442_v35  ;;  %v3505_v38 = vpack.c.bf16 %v3498_v33, %v3497_v36  ;;  %v3506_v50 = vpack.c.bf16 %v3500_v40, %v3499_v37 }
 0x50c   : > { %v3176_v49 = vpop.f32.mrb[84].mxu1 }
 0x50d   : > { %v3371_v51 = vsel %vm933_vm2, %v3176_v49, 0.0  ;;  %v4367_v53 = vpop.f32.mrb[85].mxu1  ;;  %4402 = vmatpush3.bf16.msra.mxu1 %v3505_v38  ;;  %v3917_v38 = vld [vmem:[%s807_s19] ss:$0 sm:$0xff] }
 0x50e   : > { %v3372_v54 = vadd.f32 %v3371_v51, %v3370_v43  ;;  %v3179_v41 = vpop.f32.mrb[86].mxu1  ;;  %4403 = vmatprep.subr.bf16.mxu1 %v4512_v9 }
 0x50f   : > { %v4368_v42 = vpop.f32.mrb[87].mxu1  ;;  %v3911_v41 = vld [vmem:[%s5347_s24] ss:$0 sm:$0xff] }
 0x510   : > { %v3387_v58 = vadd.f32 %v3910_v39, %v3372_v54  ;;  %v3222_v59 = vpop.f32.mrb[88].mxu0 }
 0x511   : > { %v4373_v60 = vpop.f32.mrb[89].mxu0  ;;  %v3373_v3 = vsel %vm933_vm2, %v3222_v59, 0.0  ;;  %4404 = vmatpush3.bf16.msra.mxu1 %v3506_v50 }
 0x512   : > { %v3225_v45 = vpop.f32.mrb[90].mxu0  ;;  %v3389_v0 = vadd.f32 %v4472_v62, %v3387_v58  ;;  %4405 = vmatprep.subr.bf16.mxu1 %v4512_v9  ;;  %v3912_v60 = vld [vmem:[%s5348_s26] ss:$0 sm:$0xff] }
 0x513   : > { %v4374_v52 = vpop.f32.mrb[91].mxu0 }
 0x514   : > { %v3268_v1 = vpop.f32.mrb[88].mxu1  ;;  %v3393_v2 = vsel %vm933_vm2, %v3389_v0, 0.0 }
 0x515   : > { %v3374_v4 = vsel %vm933_vm2, %v3268_v1, 0.0  ;;  %v4379_v5 = vpop.f32.mrb[89].mxu1  ;;  %3394 = vadd.xlane.f32.xlu0 %v3393_v2  ;;  %v3501_v1 = vld [vmem:[%s4689_s8 + $0x20] sm:$0xff]  ;;  %v3502_v2 = vld [vmem:[%s4689_s8 + $0x28] sm:$0xff] }
 0x516   : > { %v3375_v7 = vadd.f32 %v3374_v4, %v3373_v3  ;;  %v3271_v8 = vpop.f32.mrb[90].mxu1  ;;  %v3507_v3 = vpack.c.bf16 %v3502_v2, %v3501_v1  ;;  %v3503_v4 = vld [vmem:[%s4689_s8 + $0x30] sm:$0xff]  ;;  %v3504_v5 = vld [vmem:[%s4689_s8 + $0x38] sm:$0xff] }
 0x517   : > { %v4380_v10 = vpop.f32.mrb[91].mxu1  ;;  %v3913_v8 = vld [vmem:[%s5349_s22] ss:$0 sm:$0xff] }
 0x518   : > { %v3314_v46 = vpop.f32.mrb[92].mxu0  ;;  %4406 = vmatpush3.bf16.msra.mxu1 %v3507_v3 }
 0x519   : > { %v3376_v56 = vsel %vm933_vm2, %v3314_v46, 0.0  ;;  %v4385_v12 = vpop.f32.mrb[93].mxu0  ;;  %4407 = vmatprep.subr.bf16.mxu1 %v4512_v9 }
 0x51a   : > { %v3377_v13 = vadd.f32 %v3376_v56, %v3375_v7  ;;  %v3317_v6 = vpop.f32.mrb[94].mxu0  ;;  %v3508_v7 = vpack.c.bf16 %v3504_v5, %v3503_v4 }
 0x51b   : > { %v4386_v14 = vpop.f32.mrb[95].mxu0 }
 0x51c   : > { %v3360_v15 = vpop.f32.mrb[92].mxu1  ;;  %4408 = vmatpush3.bf16.msra.mxu1 %v3508_v7 }
 0x51d   : > { %v3378_v61 = vsel %vm933_vm2, %v3360_v15, 0.0  ;;  %v4391_v11 = vpop.f32.mrb[93].mxu1 }
 0x51e   : > { %v3379_v48 = vadd.f32 %v3378_v61, %v3377_v13  ;;  %v3363_v16 = vpop.f32.mrb[94].mxu1  ;;  %v3915_v61 = vld [vmem:[%s804_s6] ss:$0 sm:$0xff]  ;;  %s5350_s6 = sld [smem:[#allocation7_spill]] }
 0x51f   : > { %v4392_v17 = vpop.f32.mrb[95].mxu1 }
 0x520   : > { %v3388_v18 = vadd.f32 %v3910_v39, %v3379_v48 }
 0x522   : > { %v3390_v19 = vadd.f32 %v4473_v24, %v3388_v18 }
 0x524   : > { %v3396_v20 = vsel %vm933_vm2, %v3390_v19, 0.0  ;;  %p4417_p5 = scmp.eq.s32.totalorder %s5350_s6, 1 }
 0x525   : > { %3397 = vadd.xlane.f32.xlu1 %v3396_v20 }
 0x526   : > { %p4476_p7 = pnand %p4475_p6, %p4417_p5 }
 0x528   : > { %p4477_p8 = pneg %p4476_p7 }
 0x52a   : > { %p4484_p12 = pnand %p4483_p11, %p4477_p8 }
 0x5a2   : > { %v3395_v63 = vpop.xlane.xlu0 %3394 }
 0x5a3   : > { %v3400_v21 = vmul.f32 0.03125, %v3395_v63 }
 0x5a5   : > { %v3402_v22 = vsub.f32 %v3389_v0, %v3400_v21 }
 0x5a7   : > { %v3404_v23 = vmul.f32 %v3402_v22, %v3402_v22 }
 0x5a9   : > { %v3406_v25 = vsel %vm933_vm2, %v3404_v23, 0.0 }
 0x5aa   : > { %3407 = vadd.xlane.f32.xlu0 %v3406_v25 }
 0x5b2   : > { %v3398_v26 = vpop.xlane.xlu1 %3397 }
 0x5b3   : > { %v3401_v55 = vmul.f32 0.03125, %v3398_v26 }
 0x5b5   : > { %v3403_v57 = vsub.f32 %v3390_v19, %v3401_v55 }
 0x5b7   : > { %v3405_v27 = vmul.f32 %v3403_v57, %v3403_v57 }
 0x5b9   : > { %v3409_v28 = vsel %vm933_vm2, %v3405_v27, 0.0 }
 0x5ba   : > { %3410 = vadd.xlane.f32.xlu1 %v3409_v28 }
 0x637   : > { %v3408_v43 = vpop.xlane.xlu0 %3407 }
 0x638   : > { %v3412_v44 = vmul.f32 0.03125, %v3408_v43  ;;  %v3918_v43 = vld [vmem:[%s810_s2] ss:$0 sm:$0xff] }
 0x63a   : > { %v3414_v47 = vadd.f32 1e-05, %v3412_v44 }
 0x63c   : > { %4464 = vrsqrt.f32 %v3414_v47 }
 0x646   : > { %v4465_v53 = vpop.eup %4464 }
 0x647   : > { %v3411_v49 = vpop.xlane.xlu1 %3410  ;;  %v3418_v54 = vmul.f32 %v4465_v53, %v3402_v22 }
 0x648   : > { %v3413_v51 = vmul.f32 0.03125, %v3411_v49 }
 0x649   : > { %v3426_v58 = vmul.f32 %v3911_v41, %v3418_v54 }
 0x64a   : > { %v3415_v39 = vadd.f32 1e-05, %v3413_v51 }
 0x64b   : > { %v3434_v62 = vadd.f32 %v3912_v60, %v3426_v58 }
 0x64c   : > { %4466 = vrsqrt.f32 %v3415_v39 }
 0x656   : > { %v4467_v42 = vpop.eup %4466 }
 0x657   : > { %v3419_v59 = vmul.f32 %v4467_v42, %v3403_v57 }
 0x659   : > { %v3427_v45 = vmul.f32 %v3911_v41, %v3419_v59 }
 0x65b   : > { %v3435_v0 = vadd.f32 %v3912_v60, %v3427_v45 }
 0x65d   : > { %v3436_v52 = vpack.c.bf16 %v3435_v0, %v3434_v62 }
 0x65f   : > { %4398 = vmatmul.mubr.msk.bf16.vlgmr.msra.gmra.mrb[96].mxu0 %vm933_vm2, %v3436_v52 }
 0x732   : > { %v3487_v10 = vpop.f32.mrb[96].mxu0 }
 0x733   : > { %v3488_v46 = vadd.f32 %v3913_v8, %v3487_v10  ;;  %v4399_v56 = vpop.f32.mrb[97].mxu0 }
 0x734   : > { %v3490_v12 = vpop.f32.mrb[98].mxu0 }
 0x735   : > { %v3491_v13 = vadd.f32 %v3913_v8, %v3490_v12  ;;  %v4400_v6 = vpop.f32.mrb[99].mxu0  ;;  %v3494_v14 = vmax.f32 %v3488_v46, 0.0 }
 0x737   : > { %v3495_v15 = vmax.f32 %v3491_v13, 0.0 }
 0x739   : > { %v3496_v9 = vpack.c.bf16 %v3495_v15, %v3494_v14 }
 0x73b   : > { %4410 = vmatmul.mubr.msk.bf16.vlgmr.msra.gmra.mrb[96].mxu1 %vm3516_vm5, %v3496_v9 }
 0x80e   : > { %v3554_v11 = vpop.f32.mrb[96].mxu1 }
 0x80f   : > { %v3555_v48 = vadd.f32 %v3915_v61, %v3554_v11  ;;  %v4411_v16 = vpop.f32.mrb[97].mxu1 }
 0x810   : > { %v3557_v17 = vpop.f32.mrb[98].mxu1 }
 0x811   : > { %v3558_v18 = vadd.f32 %v3915_v61, %v3557_v17  ;;  %v4412_v24 = vpop.f32.mrb[99].mxu1  ;;  %v3561_v19 = vadd.f32 %v3555_v48, %v3434_v62 }
 0x813   : > { %v3565_v20 = vsel %vm933_vm2, %v3561_v19, 0.0  ;;  %v3562_v63 = vadd.f32 %v3558_v18, %v3435_v0 }
 0x814   : > { %3566 = vadd.xlane.f32.xlu0 %v3565_v20 }
 0x815   : > { %v3568_v21 = vsel %vm933_vm2, %v3562_v63, 0.0 }
 0x816   : > { %3569 = vadd.xlane.f32.xlu1 %v3568_v21 }
 0x8a1   : > { %v3567_v22 = vpop.xlane.xlu0 %3566 }
 0x8a2   : > { %v3571_v23 = vmul.f32 0.03125, %v3567_v22 }
 0x8a3   : > { %v3570_v25 = vpop.xlane.xlu1 %3569 }
 0x8a4   : > { %v3573_v26 = vsub.f32 %v3561_v19, %v3571_v23  ;;  %v3572_v55 = vmul.f32 0.03125, %v3570_v25 }
 0x8a6   : > { %v3574_v57 = vsub.f32 %v3562_v63, %v3572_v55  ;;  %v3575_v27 = vmul.f32 %v3573_v26, %v3573_v26 }
 0x8a8   : > { %v3577_v28 = vsel %vm933_vm2, %v3575_v27, 0.0  ;;  %v3576_v29 = vmul.f32 %v3574_v57, %v3574_v57 }
 0x8a9   : > { %3578 = vadd.xlane.f32.xlu0 %v3577_v28 }
 0x8aa   : > { %v3580_v30 = vsel %vm933_vm2, %v3576_v29, 0.0 }
 0x8ab   : > { %3581 = vadd.xlane.f32.xlu1 %v3580_v30 }
 0x936   : > { %v3579_v31 = vpop.xlane.xlu0 %3578 }
 0x937   : > { %v3583_v32 = vmul.f32 0.03125, %v3579_v31 }
 0x938   : > { %v3582_v34 = vpop.xlane.xlu1 %3581 }
 0x939   : > { %v3585_v35 = vadd.f32 1e-05, %v3583_v32  ;;  %v3584_v36 = vmul.f32 0.03125, %v3582_v34 }
 0x93b   : > { %4468 = vrsqrt.f32 %v3585_v35  ;;  %v3586_v33 = vadd.f32 1e-05, %v3584_v36 }
 0x93d   : > { %4470 = vrsqrt.f32 %v3586_v33 }
 0x945   : > { %v4469_v37 = vpop.eup %4468 }
 0x946   : > { %v3589_v40 = vmul.f32 %v4469_v37, %v3573_v26 }
 0x947   : > { %v4471_v50 = vpop.eup %4470 }
 0x948   : > { %v3590_v44 = vmul.f32 %v4471_v50, %v3574_v57  ;;  %v3597_v47 = vmul.f32 %v3917_v38, %v3589_v40 }
 0x94a   : > { %v3598_v49 = vmul.f32 %v3917_v38, %v3590_v44  ;;  %v3605_v51 = vadd.f32 %v3918_v43, %v3597_v47 }
 0x94c   : > { %v3606_v39 = vadd.f32 %v3918_v43, %v3598_v49  ;;  %3607 = vst.msk [vmem:[#allocation2] sm:$0xff] %vm933_vm2, %v3605_v51  ;;  %3609 = vst.msk [vmem:[#allocation3] sm:$0xff] %vm933_vm2, %v3605_v51 }
 0x94e   : > { %3608 = vst.msk [vmem:[#allocation2 + $0x8] sm:$0xff] %vm933_vm2, %v3606_v39  ;;  %3610 = vst.msk [vmem:[#allocation3 + $0x8] sm:$0xff] %vm933_vm2, %v3606_v39 }
 0x94f   : > { %4487 = shalt.err (!%p4484_p12)
}
 0x950   : > { %s5351_s3 = sld [smem:[#allocation21_spill]] }
 0x956   : > { %s4488_s0 = scalar_lea.hbm %s5351_s3, 256 }
 0x957   : > { %p4489_p13 = scmp.ne.s32.totalorder %s5351_s3, %s4488_s0  ;;  %p4494_p2 = scmp.lt.u32.totalorder %s4488_s0, %s5351_s3 }
 0x959   : > { %p4490_p0 = pnand %p4489_p13, %p4417_p5 }
 0x95b   : > { %p4491_p1 = pneg %p4490_p0 }
 0x95d   : > { %p4496_p3 = pnand %p4494_p2, %p4491_p1 }
 0x95f   : > { %4499 = shalt.err (!%p4496_p3)
}
 0x960   : > { %s4515_s5 = smov 128   ;;  %s4516_s27 = smov 8  }
 0x961   : > { %4414 = dma.vmem_to_hbm [thread:$0]  (%p4417_p5), %s3618_s7, 256, %s5351_s3, [#allocation4], %s4515_s5, %s4515_s5, %s4516_s27  }
 0x962   : > { %4505 = dma.done.wait (%p4417_p5), [#allocation4], 256  }
 0x963   : > { %4507 = vsyncadd (%p4417_p5), [#allocation4], 4294967040 }
 0x964 PF: > { %s5352_s8 = sld [smem:[#allocation6_spill]] }
 0x96a   : > { %s29_s27 = sadd.s32 1, %s5352_s8  }
 0x96b   : > { %p26_p4 = scmp.ge.s32.totalorder %s29_s27, 4  }
 0x96d   :  { %28 = sbr.rel (!%p26_p4) target bundleno = 13 (0xd), region = 168 }
 0x974   :  { %3633 = vsyncpa [#allocation4], 1 }
 0x975   :  { %3635 = vsyncpa [#allocation4 + $0x1], 1 }

</bundles_post_ra>
